<compile_context>
chip_gen: v7x
topology: tpu7x:2x2x1
jax: 0.10.0
libtpu: 0.0.40
codegen_flags: <defaults>
</compile_context>

<pallas_src>
import functools
import math

import jax
import jax.numpy as jnp
import numpy as np
from jax.experimental import pallas as pl
from jax.experimental.pallas import tpu as pltpu


# ---------------------------------------------------------------------------
# Pallas kernel: one grid step == one chunk of Tc timesteps.
# ---------------------------------------------------------------------------
def _eslstm_kernel(
    x_ref,        # (Tc, B, D)     raw input chunk
    u_ref,        # (D, 4*DN)      fused (block) input weights, j-gate scaled by 2
    b_ref,        # (1, 4*DN)      fused biases, j-gate scaled by 2
    w_ref,        # (DN, 4*DN)     fused block-diagonal recurrent weights, j*2
    out_ref,      # (Tc, B, DN)    h_t for every timestep of the chunk
    cfin_ref,     # (B, DN)        final cell state (constant-index block)
    xub_sc,       # (Tc, B, 4*DN)  per-chunk x*U + b scratch
    h_sc, c_sc,   # (B, DN) f32    recurrent state carried across chunks
):
    chunk = pl.program_id(0)

    @pl.when(chunk == 0)
    def _():
        h_sc[...] = jnp.zeros_like(h_sc)
        c_sc[...] = jnp.zeros_like(c_sc)

    tc, bsz, d_in = x_ref.shape
    dn = out_ref.shape[-1]

    # ---- hoisted input term for the whole chunk (off the recurrent path) ----
    # xub[t, b, g*DN + d*N + k] = x[t, b, d] * U_g[d, k] + b_g[d, k]
    # computed as one small lane-dense matmul against the block-structured
    # u_ref, then parked in VMEM so the unrolled loop doesn't hold it in vregs.
    x_flat = x_ref[...].reshape(tc * bsz, d_in)
    xub = jnp.dot(x_flat, u_ref[...], preferred_element_type=jnp.float32)
    xub_sc[...] = (xub + b_ref[...]).reshape(tc, bsz, 4 * dn)

    dt_n = 0.01
    coef_m = -0.5 * dt_n / 64.0          # exp arg coefficient, tau_m = 64
    coef_a = -0.5 * dt_n / 32.0          # exp arg coefficient, tau_adp = 32
    alpha_o = math.exp(-dt_n)            # output_SpikeNeuron, tau_m = 1

    def step(t, carry):
        h, c = carry                                        # (B, DN) f32 each
        # One lane-dense MXU matmul covering all 4 gates of all D dims.
        pre = jnp.dot(h, w_ref[...],
                      preferred_element_type=jnp.float32) + xub_sc[t]
        # Single wide sigmoid over all four gates; the j gate's 2x is folded
        # into its weight/bias columns, so tanh(z) = 2*sigmoid(2z) - 1.
        s = jax.nn.sigmoid(pre)
        j_t = 2.0 * s[:, 0 * dn:1 * dn] - 1.0
        i_t = s[:, 1 * dn:2 * dn]
        f_t = s[:, 2 * dn:3 * dn]
        o_t = s[:, 3 * dn:4 * dn]

        # mem_update_ahs(inputs=h, mem=j_t, spike=i_t,
        #                tau_adp=32, b=0.1, tau_m=64, dt=0.01, isAdapt=1)
        # exp(x) ~= 1 + x for |x| <= 1.6e-4 (error < 1.3e-8).
        alpha_m = 1.0 + coef_m * j_t
        ro = 1.0 + coef_a * i_t
        b_adp = ro * 0.1 + (1.0 - ro) * i_t
        b_thr = 0.04 + 1.8 * b_adp
        mem = j_t * alpha_m + (1.0 - alpha_m) * h - b_thr * i_t * dt_n  # R_m=1
        spike = (mem - b_thr > 0).astype(jnp.float32)                   # ActFun_our

        # output_SpikeNeuron(inputs=spike, mem=mem, tau_m=1, dt=0.01)
        mem_out = mem * alpha_o + (1.0 - alpha_o) * spike + 0.08

        c_new = c * f_t + i_t * spike * mem_out
        h_new = o_t * jnp.tanh(c_new)
        out_ref[t] = h_new.astype(out_ref.dtype)
        return h_new, c_new

    h_last, c_last = jax.lax.fori_loop(
        0, tc, step, (h_sc[...], c_sc[...]), unroll=min(tc, 8))

    h_sc[...] = h_last
    c_sc[...] = c_last
    # Cheap VMEM store every chunk; the constant-index out_spec keeps this
    # block resident, so the last chunk's value is what lands in HBM.
    cfin_ref[...] = c_last.astype(cfin_ref.dtype)


# ---------------------------------------------------------------------------
# Wrapper
# ---------------------------------------------------------------------------
def _block_diag(w):
    """(D, N, N) -> (D*N, D*N) block-diagonal (one N x N block per input dim)."""
    d, n, _ = w.shape
    eye = jnp.eye(d, dtype=w.dtype)
    return jnp.einsum('dnm,de->dnem', w, eye).reshape(d * n, d * n)


def _u_block(u):
    """(D, 1, N) -> (D, D*N): row d carries U[d] in its own N-column block."""
    d, _, n = u.shape
    eye = jnp.eye(d, dtype=u.dtype)
    return jnp.einsum('dk,de->dek', u[:, 0, :], eye).reshape(d, d * n)


@functools.partial(jax.jit, static_argnames=('time_chunk',))
def eslstm_forward(x, params, time_chunk=8):
    """x: (B, T, D) float32. Returns (outputs (B,T,D,N), (h_T, c_T))."""
    B, T, D = x.shape
    N = params['W_j'].shape[-1]
    DN = D * N

    # Largest time chunk <= time_chunk that divides T.
    tc = min(time_chunk, T)
    while T % tc:
        tc -= 1

    # Pad batch to a full 8-row f32 sublane tile: unmasked stores and full
    # sublane occupancy at the same vreg count; padded rows are discarded.
    B_pad = max(8, -(-B // 8) * 8)
    x_tb = jnp.transpose(x, (1, 0, 2))                      # (T, B, D)
    if B_pad != B:
        x_tb = jnp.pad(x_tb, ((0, 0), (0, B_pad - B), (0, 0)))

    # ---- one-time packing; ordinary XLA, outside the recurrent hot path ----
    # Gate-major columns g*DN + d*N + k; factor 2 folded into the 'j' gate so
    # the kernel can use one wide sigmoid (tanh(z) = 2*sigmoid(2z) - 1).
    gate_scale = {'j': 2.0, 'i': 1.0, 'f': 1.0, 'o': 1.0}
    w_big = jnp.concatenate(
        [gate_scale[g] * _block_diag(params[f'W_{g}']) for g in 'jifo'],
        axis=1)                                             # (DN, 4DN)
    u_big = jnp.concatenate(
        [gate_scale[g] * _u_block(params[f'U_{g}']) for g in 'jifo'],
        axis=1)                                             # (D, 4DN)
    b_big = jnp.concatenate(
        [gate_scale[g] * params[f'b_{g}'].reshape(1, DN) for g in 'jifo'],
        axis=1)                                             # (1, 4DN)

    grid_spec = pltpu.PrefetchScalarGridSpec(
        num_scalar_prefetch=0,
        grid=(T // tc,),
        in_specs=[
            pl.BlockSpec((tc, B_pad, D), lambda c: (c, 0, 0)),
            pl.BlockSpec((D, 4 * DN), lambda c: (0, 0)),
            pl.BlockSpec((1, 4 * DN), lambda c: (0, 0)),
            pl.BlockSpec((DN, 4 * DN), lambda c: (0, 0)),
        ],
        out_specs=[
            pl.BlockSpec((tc, B_pad, DN), lambda c: (c, 0, 0)),
            pl.BlockSpec((B_pad, DN), lambda c: (0, 0)),
        ],
        scratch_shapes=[
            pltpu.VMEM((tc, B_pad, 4 * DN), jnp.float32),   # per-chunk x*U+b
            pltpu.VMEM((B_pad, DN), jnp.float32),           # h carry
            pltpu.VMEM((B_pad, DN), jnp.float32),           # c carry
        ],
    )

    out_flat, c_fin_flat = pl.pallas_call(
        _eslstm_kernel,
        out_shape=(
            jax.ShapeDtypeStruct((T, B_pad, DN), jnp.float32),
            jax.ShapeDtypeStruct((B_pad, DN), jnp.float32),
        ),
        grid_spec=grid_spec,
        compiler_params=pltpu.CompilerParams(
            dimension_semantics=("arbitrary",)),   # recurrence: serial chunks
    )(x_tb, u_big, b_big, w_big)

    outputs = jnp.transpose(out_flat.reshape(T, B_pad, D, N), (1, 0, 2, 3))[:B]
    h_fin = outputs[:, -1]
    c_fin = c_fin_flat.reshape(B_pad, D, N)[:B]
    return outputs, (h_fin, c_fin)


# ---------------------------------------------------------------------------
# Pure-JAX reference (direct transcription of the PyTorch forward)
# ---------------------------------------------------------------------------
def eslstm_reference(x, params):
    B, T, D = x.shape
    N = params['W_j'].shape[-1]
    hp = jax.lax.Precision.HIGHEST
    h = jnp.zeros((B, D, N), jnp.float32)
    c = jnp.zeros((B, D, N), jnp.float32)
    outs = []
    for t in range(T):
        x_t = x[:, t, :][:, None, :]                      # (B, 1, D)

        def gate(Wn, Un, bn):
            hw = jnp.einsum('bij,ijk->bik', h, params[Wn], precision=hp)
            xu = jnp.einsum('bij,jik->bjk', x_t, params[Un], precision=hp)
            return hw + xu + params[bn]

        j = jnp.tanh(gate('W_j', 'U_j', 'b_j'))
        i = jax.nn.sigmoid(gate('W_i', 'U_i', 'b_i'))
        f = jax.nn.sigmoid(gate('W_f', 'U_f', 'b_f'))
        o = jax.nn.sigmoid(gate('W_o', 'U_o', 'b_o'))

        dt_n = 0.01
        alpha_m = jnp.exp(-1.0 * (dt_n / 64.0) * 0.5 * j)
        ro = jnp.exp(-1.0 * (dt_n / 32.0) * 0.5 * i)
        b_adp = ro * 0.1 + (1 - ro) * i
        B_thr = 0.04 + 1.8 * b_adp
        mem = j * alpha_m + (1 - alpha_m) * h - B_thr * i * dt_n
        spike = (mem - B_thr > 0).astype(jnp.float32)
        mem_out = mem * jnp.exp(-0.01) + (1.0 - jnp.exp(-0.01)) * spike + 0.08

        c = c * f + i * spike * mem_out
        h = o * jnp.tanh(c)
        outs.append(h)
    return jnp.stack(outs, axis=1), (h, c)


# ---------------------------------------------------------------------------
# Main
# ---------------------------------------------------------------------------
if __name__ == "__main__":
    B, T, D, N = 2, 8, 4, 32
    init_std = 0.02

    key = jax.random.PRNGKey(0)
    keys = jax.random.split(key, 13)
    # b_j is biased (+0.6) so the adaptive-spiking path actually fires
    # (spike = 1 with a wide ~0.1+ margin from the hard threshold) and the
    # recurrence produces non-trivial outputs, while staying robust to the
    # contraction-order / exp-approximation changes in the fused kernel.
    params = {
        'U_j': jax.random.normal(keys[0], (D, 1, N), jnp.float32) * init_std,
        'U_i': jax.random.normal(keys[1], (D, 1, N), jnp.float32) * init_std,
        'U_f': jax.random.normal(keys[2], (D, 1, N), jnp.float32) * init_std,
        'U_o': jax.random.normal(keys[3], (D, 1, N), jnp.float32) * init_std,
        'W_j': jax.random.normal(keys[4], (D, N, N), jnp.float32) * init_std,
        'W_i': jax.random.normal(keys[5], (D, N, N), jnp.float32) * init_std,
        'W_f': jax.random.normal(keys[6], (D, N, N), jnp.float32) * init_std,
        'W_o': jax.random.normal(keys[7], (D, N, N), jnp.float32) * init_std,
        'b_j': 0.6 + jax.random.normal(keys[8], (D, N), jnp.float32) * init_std,
        'b_i': jax.random.normal(keys[9], (D, N), jnp.float32) * init_std,
        'b_f': jax.random.normal(keys[10], (D, N), jnp.float32) * init_std,
        'b_o': jax.random.normal(keys[11], (D, N), jnp.float32) * init_std,
    }
    x = jax.random.normal(keys[12], (B, T, D), jnp.float32)

    ref_out, (ref_h, ref_c) = eslstm_reference(x, params)

    # Single chunk (whole sequence resident in one grid step) ...
    out1, (h1, c1) = eslstm_forward(x, params, time_chunk=8)
    # ... and two chunks, exercising the cross-chunk h/c carry in VMEM scratch.
    out2, (h2, c2) = eslstm_forward(x, params, time_chunk=4)
    jax.block_until_ready((out1, h1, c1, out2, h2, c2))

    tol = dict(rtol=5e-4, atol=5e-4)   # contraction layout / exp~=1+x differ
    for out_k, h_k, c_k in ((out1, h1, c1), (out2, h2, c2)):
        np.testing.assert_allclose(np.asarray(out_k), np.asarray(ref_out), **tol)
        np.testing.assert_allclose(np.asarray(h_k), np.asarray(ref_h), **tol)
        np.testing.assert_allclose(np.asarray(c_k), np.asarray(ref_c), **tol)

    assert out1.shape == (B, T, D, N)
    print("KERNEL_OK")
</pallas_src>

<mosaic_0001>
module attributes {stable_mosaic.version = 11 : i64} {
  func.func @_eslstm_kernel(%arg0: i32, %arg1: memref<8x8x4xf32, #tpu.memory_space<vmem>>, %arg2: memref<4x512xf32, #tpu.memory_space<vmem>>, %arg3: memref<1x512xf32, #tpu.memory_space<vmem>>, %arg4: memref<128x512xf32, #tpu.memory_space<vmem>>, %arg5: memref<8x8x128xf32, #tpu.memory_space<vmem>>, %arg6: memref<8x128xf32, #tpu.memory_space<vmem>>, %arg7: memref<8x8x512xf32, #tpu.memory_space<vmem>>, %arg8: memref<8x128xf32, #tpu.memory_space<vmem>>, %arg9: memref<8x128xf32, #tpu.memory_space<vmem>>) attributes {dimension_semantics = [#tpu.dimension_semantics<arbitrary>], iteration_bounds = array<i64: 1>, scalar_prefetch = 0 : i64, scratch_operands = 3 : i64, tpu.core_type = #tpu.core_type<tc>, window_params = [{transform_indices = @transform_0, window_bounds = array<i64: 8, 8, 4>}, {pipeline_mode = #tpu.pipeline_mode<synchronous>, transform_indices = @transform_1, window_bounds = array<i64: 4, 512>}, {pipeline_mode = #tpu.pipeline_mode<synchronous>, transform_indices = @transform_2, window_bounds = array<i64: 1, 512>}, {pipeline_mode = #tpu.pipeline_mode<synchronous>, transform_indices = @transform_3, window_bounds = array<i64: 128, 512>}, {transform_indices = @transform_4, window_bounds = array<i64: 8, 8, 128>}, {pipeline_mode = #tpu.pipeline_mode<synchronous>, transform_indices = @transform_5, window_bounds = array<i64: 8, 128>}]} {
    %c0_i32 = arith.constant 0 : i32
    %0 = arith.cmpi eq, %arg0, %c0_i32 : i32
    %1 = arith.extui %0 : i1 to i32
    %c0_i32_0 = arith.constant 0 : i32
    %2 = arith.cmpi ne, %1, %c0_i32_0 : i32
    scf.if %2 {
      %cst_213 = arith.constant 0.000000e+00 : f32
      %561 = vector.broadcast %cst_213 : f32 to vector<8x128xf32>
      %c0_214 = arith.constant 0 : index
      %c0_215 = arith.constant 0 : index
      %562 = vector.load %arg8[%c0_214, %c0_215] : memref<8x128xf32, #tpu.memory_space<vmem>>, vector<8x128xf32>
      tpu.vector_store %arg8[%c0_214, %c0_215], %561 {strides = array<i32>} : memref<8x128xf32, #tpu.memory_space<vmem>>, vector<8x128xf32>,
      %cst_216 = arith.constant 0.000000e+00 : f32
      %563 = vector.broadcast %cst_216 : f32 to vector<8x128xf32>
      %c0_217 = arith.constant 0 : index
      %c0_218 = arith.constant 0 : index
      %564 = vector.load %arg9[%c0_217, %c0_218] : memref<8x128xf32, #tpu.memory_space<vmem>>, vector<8x128xf32>
      tpu.vector_store %arg9[%c0_217, %c0_218], %563 {strides = array<i32>} : memref<8x128xf32, #tpu.memory_space<vmem>>, vector<8x128xf32>,
    } else {
    }
    %c0 = arith.constant 0 : index
    %c0_1 = arith.constant 0 : index
    %c0_2 = arith.constant 0 : index
    %3 = vector.load %arg1[%c0, %c0_1, %c0_2] : memref<8x8x4xf32, #tpu.memory_space<vmem>>, vector<8x8x4xf32>
    %4 = vector.shape_cast %3 : vector<8x8x4xf32> to vector<64x4xf32>
    %c0_3 = arith.constant 0 : index
    %c0_4 = arith.constant 0 : index
    %5 = vector.load %arg2[%c0_3, %c0_4] : memref<4x512xf32, #tpu.memory_space<vmem>>, vector<4x512xf32>
    %cst = arith.constant dense<0.000000e+00> : vector<64x512xf32>
    %6 = tpu.matmul %4, %5, %cst {dimension_numbers = #tpu.dot_dimension_numbers<[1], [0], [0], [1], [0, 0, 1, 1], [], []>} : vector<64x4xf32>, vector<4x512xf32>, vector<64x512xf32> -> vector<64x512xf32>
    %c0_5 = arith.constant 0 : index
    %c0_6 = arith.constant 0 : index
    %7 = vector.load %arg3[%c0_5, %c0_6] : memref<1x512xf32, #tpu.memory_space<vmem>>, vector<1x512xf32>
    %8 = vector.broadcast %7 : vector<1x512xf32> to vector<64x512xf32>
    %9 = arith.addf %6, %8 : vector<64x512xf32>
    %10 = vector.shape_cast %9 : vector<64x512xf32> to vector<8x8x512xf32>
    %c0_7 = arith.constant 0 : index
    %c0_8 = arith.constant 0 : index
    %c0_9 = arith.constant 0 : index
    %11 = vector.load %arg7[%c0_7, %c0_8, %c0_9] : memref<8x8x512xf32, #tpu.memory_space<vmem>>, vector<8x8x512xf32>
    tpu.vector_store %arg7[%c0_7, %c0_8, %c0_9], %10 {strides = array<i32>} : memref<8x8x512xf32, #tpu.memory_space<vmem>>, vector<8x8x512xf32>,
    %c0_10 = arith.constant 0 : index
    %c0_11 = arith.constant 0 : index
    %12 = vector.load %arg8[%c0_10, %c0_11] : memref<8x128xf32, #tpu.memory_space<vmem>>, vector<8x128xf32>
    %c0_12 = arith.constant 0 : index
    %c0_13 = arith.constant 0 : index
    %13 = vector.load %arg9[%c0_12, %c0_13] : memref<8x128xf32, #tpu.memory_space<vmem>>, vector<8x128xf32>
    %c0_i32_14 = arith.constant 0 : i32
    %c0_15 = arith.constant 0 : index
    %c0_16 = arith.constant 0 : index
    %14 = vector.load %arg4[%c0_15, %c0_16] : memref<128x512xf32, #tpu.memory_space<vmem>>, vector<128x512xf32>
    %cst_17 = arith.constant dense<0.000000e+00> : vector<8x512xf32>
    %15 = tpu.matmul %12, %14, %cst_17 {dimension_numbers = #tpu.dot_dimension_numbers<[1], [0], [0], [1], [0, 0, 1, 1], [], []>} : vector<8x128xf32>, vector<128x512xf32>, vector<8x512xf32> -> vector<8x512xf32>
    %16 = arith.index_cast %c0_i32_14 : i32 to index
    %c0_18 = arith.constant 0 : index
    %c0_19 = arith.constant 0 : index
    %17 = vector.load %arg7[%16, %c0_18, %c0_19] : memref<8x8x512xf32, #tpu.memory_space<vmem>>, vector<1x8x512xf32>
    %18 = vector.shape_cast %17 : vector<1x8x512xf32> to vector<8x512xf32>
    %19 = arith.addf %15, %18 : vector<8x512xf32>
    %20 = arith.negf %19 : vector<8x512xf32>
    %21 = math.exp %20 : vector<8x512xf32>
    %cst_20 = arith.constant 1.000000e+00 : f32
    %22 = vector.broadcast %cst_20 : f32 to vector<8x512xf32>
    %23 = arith.addf %22, %21 : vector<8x512xf32>
    %24 = arith.divf %22, %23 : vector<8x512xf32>
    %25 = vector.extract_strided_slice %24 {offsets = [0, 0], sizes = [8, 128], strides = [1, 1]} : vector<8x512xf32> to vector<8x128xf32>
    %cst_21 = arith.constant 2.000000e+00 : f32
    %26 = vector.broadcast %cst_21 : f32 to vector<8x128xf32>
    %27 = arith.mulf %26, %25 : vector<8x128xf32>
    %cst_22 = arith.constant 1.000000e+00 : f32
    %28 = vector.broadcast %cst_22 : f32 to vector<8x128xf32>
    %29 = arith.subf %27, %28 : vector<8x128xf32>
    %30 = vector.extract_strided_slice %24 {offsets = [0, 128], sizes = [8, 128], strides = [1, 1]} : vector<8x512xf32> to vector<8x128xf32>
    %31 = vector.extract_strided_slice %24 {offsets = [0, 256], sizes = [8, 128], strides = [1, 1]} : vector<8x512xf32> to vector<8x128xf32>
    %32 = vector.extract_strided_slice %24 {offsets = [0, 384], sizes = [8, 128], strides = [1, 1]} : vector<8x512xf32> to vector<8x128xf32>
    %cst_23 = arith.constant -7.812500e-05 : f32
    %33 = vector.broadcast %cst_23 : f32 to vector<8x128xf32>
    %34 = arith.mulf %33, %29 : vector<8x128xf32>
    %cst_24 = arith.constant 1.000000e+00 : f32
    %35 = vector.broadcast %cst_24 : f32 to vector<8x128xf32>
    %36 = arith.addf %35, %34 : vector<8x128xf32>
    %cst_25 = arith.constant -1.562500e-04 : f32
    %37 = vector.broadcast %cst_25 : f32 to vector<8x128xf32>
    %38 = arith.mulf %37, %30 : vector<8x128xf32>
    %cst_26 = arith.constant 1.000000e+00 : f32
    %39 = vector.broadcast %cst_26 : f32 to vector<8x128xf32>
    %40 = arith.addf %39, %38 : vector<8x128xf32>
    %cst_27 = arith.constant 1.000000e-01 : f32
    %41 = vector.broadcast %cst_27 : f32 to vector<8x128xf32>
    %42 = arith.mulf %40, %41 : vector<8x128xf32>
    %cst_28 = arith.constant 1.000000e+00 : f32
    %43 = vector.broadcast %cst_28 : f32 to vector<8x128xf32>
    %44 = arith.subf %43, %40 : vector<8x128xf32>
    %45 = arith.mulf %44, %30 : vector<8x128xf32>
    %46 = arith.addf %42, %45 : vector<8x128xf32>
    %cst_29 = arith.constant 1.800000e+00 : f32
    %47 = vector.broadcast %cst_29 : f32 to vector<8x128xf32>
    %48 = arith.mulf %47, %46 : vector<8x128xf32>
    %cst_30 = arith.constant 4.000000e-02 : f32
    %49 = vector.broadcast %cst_30 : f32 to vector<8x128xf32>
    %50 = arith.addf %49, %48 : vector<8x128xf32>
    %51 = arith.mulf %29, %36 : vector<8x128xf32>
    %cst_31 = arith.constant 1.000000e+00 : f32
    %52 = vector.broadcast %cst_31 : f32 to vector<8x128xf32>
    %53 = arith.subf %52, %36 : vector<8x128xf32>
    %54 = arith.mulf %53, %12 : vector<8x128xf32>
    %55 = arith.addf %51, %54 : vector<8x128xf32>
    %56 = arith.mulf %50, %30 : vector<8x128xf32>
    %cst_32 = arith.constant 0.00999999977 : f32
    %57 = vector.broadcast %cst_32 : f32 to vector<8x128xf32>
    %58 = arith.mulf %56, %57 : vector<8x128xf32>
    %59 = arith.subf %55, %58 : vector<8x128xf32>
    %60 = arith.subf %59, %50 : vector<8x128xf32>
    %cst_33 = arith.constant 0.000000e+00 : f32
    %61 = vector.broadcast %cst_33 : f32 to vector<8x128xf32>
    %62 = arith.cmpf ogt, %60, %61 : vector<8x128xf32>
    %63 = arith.extui %62 : vector<8x128xi1> to vector<8x128xi32>
    %64 = arith.sitofp %63 : vector<8x128xi32> to vector<8x128xf32>
    %cst_34 = arith.constant 0.990049839 : f32
    %65 = vector.broadcast %cst_34 : f32 to vector<8x128xf32>
    %66 = arith.mulf %59, %65 : vector<8x128xf32>
    %cst_35 = arith.constant 0.00995016656 : f32
    %67 = vector.broadcast %cst_35 : f32 to vector<8x128xf32>
    %68 = arith.mulf %67, %64 : vector<8x128xf32>
    %69 = arith.addf %66, %68 : vector<8x128xf32>
    %cst_36 = arith.constant 8.000000e-02 : f32
    %70 = vector.broadcast %cst_36 : f32 to vector<8x128xf32>
    %71 = arith.addf %69, %70 : vector<8x128xf32>
    %72 = arith.mulf %13, %31 : vector<8x128xf32>
    %73 = arith.mulf %30, %64 : vector<8x128xf32>
    %74 = arith.mulf %73, %71 : vector<8x128xf32>
    %75 = arith.addf %72, %74 : vector<8x128xf32>
    %76 = math.tanh %75 : vector<8x128xf32>
    %77 = arith.mulf %32, %76 : vector<8x128xf32>
    %78 = arith.index_cast %c0_i32_14 : i32 to index
    %c0_37 = arith.constant 0 : index
    %c0_38 = arith.constant 0 : index
    %79 = vector.load %arg5[%78, %c0_37, %c0_38] : memref<8x8x128xf32, #tpu.memory_space<vmem>>, vector<1x8x128xf32>
    %80 = vector.shape_cast %79 : vector<1x8x128xf32> to vector<8x128xf32>
    %81 = vector.shape_cast %77 : vector<8x128xf32> to vector<1x8x128xf32>
    tpu.vector_store %arg5[%78, %c0_37, %c0_38], %81 {strides = array<i32>} : memref<8x8x128xf32, #tpu.memory_space<vmem>>, vector<1x8x128xf32>,
    %c1_i32 = arith.constant 1 : i32
    %c0_39 = arith.constant 0 : index
    %c0_40 = arith.constant 0 : index
    %82 = vector.load %arg4[%c0_39, %c0_40] : memref<128x512xf32, #tpu.memory_space<vmem>>, vector<128x512xf32>
    %cst_41 = arith.constant dense<0.000000e+00> : vector<8x512xf32>
    %83 = tpu.matmul %77, %82, %cst_41 {dimension_numbers = #tpu.dot_dimension_numbers<[1], [0], [0], [1], [0, 0, 1, 1], [], []>} : vector<8x128xf32>, vector<128x512xf32>, vector<8x512xf32> -> vector<8x512xf32>
    %84 = arith.index_cast %c1_i32 : i32 to index
    %c0_42 = arith.constant 0 : index
    %c0_43 = arith.constant 0 : index
    %85 = vector.load %arg7[%84, %c0_42, %c0_43] : memref<8x8x512xf32, #tpu.memory_space<vmem>>, vector<1x8x512xf32>
    %86 = vector.shape_cast %85 : vector<1x8x512xf32> to vector<8x512xf32>
    %87 = arith.addf %83, %86 : vector<8x512xf32>
    %88 = arith.negf %87 : vector<8x512xf32>
    %89 = math.exp %88 : vector<8x512xf32>
    %cst_44 = arith.constant 1.000000e+00 : f32
    %90 = vector.broadcast %cst_44 : f32 to vector<8x512xf32>
    %91 = arith.addf %90, %89 : vector<8x512xf32>
    %92 = arith.divf %90, %91 : vector<8x512xf32>
    %93 = vector.extract_strided_slice %92 {offsets = [0, 0], sizes = [8, 128], strides = [1, 1]} : vector<8x512xf32> to vector<8x128xf32>
    %cst_45 = arith.constant 2.000000e+00 : f32
    %94 = vector.broadcast %cst_45 : f32 to vector<8x128xf32>
    %95 = arith.mulf %94, %93 : vector<8x128xf32>
    %cst_46 = arith.constant 1.000000e+00 : f32
    %96 = vector.broadcast %cst_46 : f32 to vector<8x128xf32>
    %97 = arith.subf %95, %96 : vector<8x128xf32>
    %98 = vector.extract_strided_slice %92 {offsets = [0, 128], sizes = [8, 128], strides = [1, 1]} : vector<8x512xf32> to vector<8x128xf32>
    %99 = vector.extract_strided_slice %92 {offsets = [0, 256], sizes = [8, 128], strides = [1, 1]} : vector<8x512xf32> to vector<8x128xf32>
    %100 = vector.extract_strided_slice %92 {offsets = [0, 384], sizes = [8, 128], strides = [1, 1]} : vector<8x512xf32> to vector<8x128xf32>
    %cst_47 = arith.constant -7.812500e-05 : f32
    %101 = vector.broadcast %cst_47 : f32 to vector<8x128xf32>
    %102 = arith.mulf %101, %97 : vector<8x128xf32>
    %cst_48 = arith.constant 1.000000e+00 : f32
    %103 = vector.broadcast %cst_48 : f32 to vector<8x128xf32>
    %104 = arith.addf %103, %102 : vector<8x128xf32>
    %cst_49 = arith.constant -1.562500e-04 : f32
    %105 = vector.broadcast %cst_49 : f32 to vector<8x128xf32>
    %106 = arith.mulf %105, %98 : vector<8x128xf32>
    %cst_50 = arith.constant 1.000000e+00 : f32
    %107 = vector.broadcast %cst_50 : f32 to vector<8x128xf32>
    %108 = arith.addf %107, %106 : vector<8x128xf32>
    %cst_51 = arith.constant 1.000000e-01 : f32
    %109 = vector.broadcast %cst_51 : f32 to vector<8x128xf32>
    %110 = arith.mulf %108, %109 : vector<8x128xf32>
    %cst_52 = arith.constant 1.000000e+00 : f32
    %111 = vector.broadcast %cst_52 : f32 to vector<8x128xf32>
    %112 = arith.subf %111, %108 : vector<8x128xf32>
    %113 = arith.mulf %112, %98 : vector<8x128xf32>
    %114 = arith.addf %110, %113 : vector<8x128xf32>
    %cst_53 = arith.constant 1.800000e+00 : f32
    %115 = vector.broadcast %cst_53 : f32 to vector<8x128xf32>
    %116 = arith.mulf %115, %114 : vector<8x128xf32>
    %cst_54 = arith.constant 4.000000e-02 : f32
    %117 = vector.broadcast %cst_54 : f32 to vector<8x128xf32>
    %118 = arith.addf %117, %116 : vector<8x128xf32>
    %119 = arith.mulf %97, %104 : vector<8x128xf32>
    %cst_55 = arith.constant 1.000000e+00 : f32
    %120 = vector.broadcast %cst_55 : f32 to vector<8x128xf32>
    %121 = arith.subf %120, %104 : vector<8x128xf32>
    %122 = arith.mulf %121, %77 : vector<8x128xf32>
    %123 = arith.addf %119, %122 : vector<8x128xf32>
    %124 = arith.mulf %118, %98 : vector<8x128xf32>
    %cst_56 = arith.constant 0.00999999977 : f32
    %125 = vector.broadcast %cst_56 : f32 to vector<8x128xf32>
    %126 = arith.mulf %124, %125 : vector<8x128xf32>
    %127 = arith.subf %123, %126 : vector<8x128xf32>
    %128 = arith.subf %127, %118 : vector<8x128xf32>
    %cst_57 = arith.constant 0.000000e+00 : f32
    %129 = vector.broadcast %cst_57 : f32 to vector<8x128xf32>
    %130 = arith.cmpf ogt, %128, %129 : vector<8x128xf32>
    %131 = arith.extui %130 : vector<8x128xi1> to vector<8x128xi32>
    %132 = arith.sitofp %131 : vector<8x128xi32> to vector<8x128xf32>
    %cst_58 = arith.constant 0.990049839 : f32
    %133 = vector.broadcast %cst_58 : f32 to vector<8x128xf32>
    %134 = arith.mulf %127, %133 : vector<8x128xf32>
    %cst_59 = arith.constant 0.00995016656 : f32
    %135 = vector.broadcast %cst_59 : f32 to vector<8x128xf32>
    %136 = arith.mulf %135, %132 : vector<8x128xf32>
    %137 = arith.addf %134, %136 : vector<8x128xf32>
    %cst_60 = arith.constant 8.000000e-02 : f32
    %138 = vector.broadcast %cst_60 : f32 to vector<8x128xf32>
    %139 = arith.addf %137, %138 : vector<8x128xf32>
    %140 = arith.mulf %75, %99 : vector<8x128xf32>
    %141 = arith.mulf %98, %132 : vector<8x128xf32>
    %142 = arith.mulf %141, %139 : vector<8x128xf32>
    %143 = arith.addf %140, %142 : vector<8x128xf32>
    %144 = math.tanh %143 : vector<8x128xf32>
    %145 = arith.mulf %100, %144 : vector<8x128xf32>
    %146 = arith.index_cast %c1_i32 : i32 to index
    %c0_61 = arith.constant 0 : index
    %c0_62 = arith.constant 0 : index
    %147 = vector.load %arg5[%146, %c0_61, %c0_62] : memref<8x8x128xf32, #tpu.memory_space<vmem>>, vector<1x8x128xf32>
    %148 = vector.shape_cast %147 : vector<1x8x128xf32> to vector<8x128xf32>
    %149 = vector.shape_cast %145 : vector<8x128xf32> to vector<1x8x128xf32>
    tpu.vector_store %arg5[%146, %c0_61, %c0_62], %149 {strides = array<i32>} : memref<8x8x128xf32, #tpu.memory_space<vmem>>, vector<1x8x128xf32>,
    %c2_i32 = arith.constant 2 : i32
    %c0_63 = arith.constant 0 : index
    %c0_64 = arith.constant 0 : index
    %150 = vector.load %arg4[%c0_63, %c0_64] : memref<128x512xf32, #tpu.memory_space<vmem>>, vector<128x512xf32>
    %cst_65 = arith.constant dense<0.000000e+00> : vector<8x512xf32>
    %151 = tpu.matmul %145, %150, %cst_65 {dimension_numbers = #tpu.dot_dimension_numbers<[1], [0], [0], [1], [0, 0, 1, 1], [], []>} : vector<8x128xf32>, vector<128x512xf32>, vector<8x512xf32> -> vector<8x512xf32>
    %152 = arith.index_cast %c2_i32 : i32 to index
    %c0_66 = arith.constant 0 : index
    %c0_67 = arith.constant 0 : index
    %153 = vector.load %arg7[%152, %c0_66, %c0_67] : memref<8x8x512xf32, #tpu.memory_space<vmem>>, vector<1x8x512xf32>
    %154 = vector.shape_cast %153 : vector<1x8x512xf32> to vector<8x512xf32>
    %155 = arith.addf %151, %154 : vector<8x512xf32>
    %156 = arith.negf %155 : vector<8x512xf32>
    %157 = math.exp %156 : vector<8x512xf32>
    %cst_68 = arith.constant 1.000000e+00 : f32
    %158 = vector.broadcast %cst_68 : f32 to vector<8x512xf32>
    %159 = arith.addf %158, %157 : vector<8x512xf32>
    %160 = arith.divf %158, %159 : vector<8x512xf32>
    %161 = vector.extract_strided_slice %160 {offsets = [0, 0], sizes = [8, 128], strides = [1, 1]} : vector<8x512xf32> to vector<8x128xf32>
    %cst_69 = arith.constant 2.000000e+00 : f32
    %162 = vector.broadcast %cst_69 : f32 to vector<8x128xf32>
    %163 = arith.mulf %162, %161 : vector<8x128xf32>
    %cst_70 = arith.constant 1.000000e+00 : f32
    %164 = vector.broadcast %cst_70 : f32 to vector<8x128xf32>
    %165 = arith.subf %163, %164 : vector<8x128xf32>
    %166 = vector.extract_strided_slice %160 {offsets = [0, 128], sizes = [8, 128], strides = [1, 1]} : vector<8x512xf32> to vector<8x128xf32>
    %167 = vector.extract_strided_slice %160 {offsets = [0, 256], sizes = [8, 128], strides = [1, 1]} : vector<8x512xf32> to vector<8x128xf32>
    %168 = vector.extract_strided_slice %160 {offsets = [0, 384], sizes = [8, 128], strides = [1, 1]} : vector<8x512xf32> to vector<8x128xf32>
    %cst_71 = arith.constant -7.812500e-05 : f32
    %169 = vector.broadcast %cst_71 : f32 to vector<8x128xf32>
    %170 = arith.mulf %169, %165 : vector<8x128xf32>
    %cst_72 = arith.constant 1.000000e+00 : f32
    %171 = vector.broadcast %cst_72 : f32 to vector<8x128xf32>
    %172 = arith.addf %171, %170 : vector<8x128xf32>
    %cst_73 = arith.constant -1.562500e-04 : f32
    %173 = vector.broadcast %cst_73 : f32 to vector<8x128xf32>
    %174 = arith.mulf %173, %166 : vector<8x128xf32>
    %cst_74 = arith.constant 1.000000e+00 : f32
    %175 = vector.broadcast %cst_74 : f32 to vector<8x128xf32>
    %176 = arith.addf %175, %174 : vector<8x128xf32>
    %cst_75 = arith.constant 1.000000e-01 : f32
    %177 = vector.broadcast %cst_75 : f32 to vector<8x128xf32>
    %178 = arith.mulf %176, %177 : vector<8x128xf32>
    %cst_76 = arith.constant 1.000000e+00 : f32
    %179 = vector.broadcast %cst_76 : f32 to vector<8x128xf32>
    %180 = arith.subf %179, %176 : vector<8x128xf32>
    %181 = arith.mulf %180, %166 : vector<8x128xf32>
    %182 = arith.addf %178, %181 : vector<8x128xf32>
    %cst_77 = arith.constant 1.800000e+00 : f32
    %183 = vector.broadcast %cst_77 : f32 to vector<8x128xf32>
    %184 = arith.mulf %183, %182 : vector<8x128xf32>
    %cst_78 = arith.constant 4.000000e-02 : f32
    %185 = vector.broadcast %cst_78 : f32 to vector<8x128xf32>
    %186 = arith.addf %185, %184 : vector<8x128xf32>
    %187 = arith.mulf %165, %172 : vector<8x128xf32>
    %cst_79 = arith.constant 1.000000e+00 : f32
    %188 = vector.broadcast %cst_79 : f32 to vector<8x128xf32>
    %189 = arith.subf %188, %172 : vector<8x128xf32>
    %190 = arith.mulf %189, %145 : vector<8x128xf32>
    %191 = arith.addf %187, %190 : vector<8x128xf32>
    %192 = arith.mulf %186, %166 : vector<8x128xf32>
    %cst_80 = arith.constant 0.00999999977 : f32
    %193 = vector.broadcast %cst_80 : f32 to vector<8x128xf32>
    %194 = arith.mulf %192, %193 : vector<8x128xf32>
    %195 = arith.subf %191, %194 : vector<8x128xf32>
    %196 = arith.subf %195, %186 : vector<8x128xf32>
    %cst_81 = arith.constant 0.000000e+00 : f32
    %197 = vector.broadcast %cst_81 : f32 to vector<8x128xf32>
    %198 = arith.cmpf ogt, %196, %197 : vector<8x128xf32>
    %199 = arith.extui %198 : vector<8x128xi1> to vector<8x128xi32>
    %200 = arith.sitofp %199 : vector<8x128xi32> to vector<8x128xf32>
    %cst_82 = arith.constant 0.990049839 : f32
    %201 = vector.broadcast %cst_82 : f32 to vector<8x128xf32>
    %202 = arith.mulf %195, %201 : vector<8x128xf32>
    %cst_83 = arith.constant 0.00995016656 : f32
    %203 = vector.broadcast %cst_83 : f32 to vector<8x128xf32>
    %204 = arith.mulf %203, %200 : vector<8x128xf32>
    %205 = arith.addf %202, %204 : vector<8x128xf32>
    %cst_84 = arith.constant 8.000000e-02 : f32
    %206 = vector.broadcast %cst_84 : f32 to vector<8x128xf32>
    %207 = arith.addf %205, %206 : vector<8x128xf32>
    %208 = arith.mulf %143, %167 : vector<8x128xf32>
    %209 = arith.mulf %166, %200 : vector<8x128xf32>
    %210 = arith.mulf %209, %207 : vector<8x128xf32>
    %211 = arith.addf %208, %210 : vector<8x128xf32>
    %212 = math.tanh %211 : vector<8x128xf32>
    %213 = arith.mulf %168, %212 : vector<8x128xf32>
    %214 = arith.index_cast %c2_i32 : i32 to index
    %c0_85 = arith.constant 0 : index
    %c0_86 = arith.constant 0 : index
    %215 = vector.load %arg5[%214, %c0_85, %c0_86] : memref<8x8x128xf32, #tpu.memory_space<vmem>>, vector<1x8x128xf32>
    %216 = vector.shape_cast %215 : vector<1x8x128xf32> to vector<8x128xf32>
    %217 = vector.shape_cast %213 : vector<8x128xf32> to vector<1x8x128xf32>
    tpu.vector_store %arg5[%214, %c0_85, %c0_86], %217 {strides = array<i32>} : memref<8x8x128xf32, #tpu.memory_space<vmem>>, vector<1x8x128xf32>,
    %c3_i32 = arith.constant 3 : i32
    %c0_87 = arith.constant 0 : index
    %c0_88 = arith.constant 0 : index
    %218 = vector.load %arg4[%c0_87, %c0_88] : memref<128x512xf32, #tpu.memory_space<vmem>>, vector<128x512xf32>
    %cst_89 = arith.constant dense<0.000000e+00> : vector<8x512xf32>
    %219 = tpu.matmul %213, %218, %cst_89 {dimension_numbers = #tpu.dot_dimension_numbers<[1], [0], [0], [1], [0, 0, 1, 1], [], []>} : vector<8x128xf32>, vector<128x512xf32>, vector<8x512xf32> -> vector<8x512xf32>
    %220 = arith.index_cast %c3_i32 : i32 to index
    %c0_90 = arith.constant 0 : index
    %c0_91 = arith.constant 0 : index
    %221 = vector.load %arg7[%220, %c0_90, %c0_91] : memref<8x8x512xf32, #tpu.memory_space<vmem>>, vector<1x8x512xf32>
    %222 = vector.shape_cast %221 : vector<1x8x512xf32> to vector<8x512xf32>
    %223 = arith.addf %219, %222 : vector<8x512xf32>
    %224 = arith.negf %223 : vector<8x512xf32>
    %225 = math.exp %224 : vector<8x512xf32>
    %cst_92 = arith.constant 1.000000e+00 : f32
    %226 = vector.broadcast %cst_92 : f32 to vector<8x512xf32>
    %227 = arith.addf %226, %225 : vector<8x512xf32>
    %228 = arith.divf %226, %227 : vector<8x512xf32>
    %229 = vector.extract_strided_slice %228 {offsets = [0, 0], sizes = [8, 128], strides = [1, 1]} : vector<8x512xf32> to vector<8x128xf32>
    %cst_93 = arith.constant 2.000000e+00 : f32
    %230 = vector.broadcast %cst_93 : f32 to vector<8x128xf32>
    %231 = arith.mulf %230, %229 : vector<8x128xf32>
    %cst_94 = arith.constant 1.000000e+00 : f32
    %232 = vector.broadcast %cst_94 : f32 to vector<8x128xf32>
    %233 = arith.subf %231, %232 : vector<8x128xf32>
    %234 = vector.extract_strided_slice %228 {offsets = [0, 128], sizes = [8, 128], strides = [1, 1]} : vector<8x512xf32> to vector<8x128xf32>
    %235 = vector.extract_strided_slice %228 {offsets = [0, 256], sizes = [8, 128], strides = [1, 1]} : vector<8x512xf32> to vector<8x128xf32>
    %236 = vector.extract_strided_slice %228 {offsets = [0, 384], sizes = [8, 128], strides = [1, 1]} : vector<8x512xf32> to vector<8x128xf32>
    %cst_95 = arith.constant -7.812500e-05 : f32
    %237 = vector.broadcast %cst_95 : f32 to vector<8x128xf32>
    %238 = arith.mulf %237, %233 : vector<8x128xf32>
    %cst_96 = arith.constant 1.000000e+00 : f32
    %239 = vector.broadcast %cst_96 : f32 to vector<8x128xf32>
    %240 = arith.addf %239, %238 : vector<8x128xf32>
    %cst_97 = arith.constant -1.562500e-04 : f32
    %241 = vector.broadcast %cst_97 : f32 to vector<8x128xf32>
    %242 = arith.mulf %241, %234 : vector<8x128xf32>
    %cst_98 = arith.constant 1.000000e+00 : f32
    %243 = vector.broadcast %cst_98 : f32 to vector<8x128xf32>
    %244 = arith.addf %243, %242 : vector<8x128xf32>
    %cst_99 = arith.constant 1.000000e-01 : f32
    %245 = vector.broadcast %cst_99 : f32 to vector<8x128xf32>
    %246 = arith.mulf %244, %245 : vector<8x128xf32>
    %cst_100 = arith.constant 1.000000e+00 : f32
    %247 = vector.broadcast %cst_100 : f32 to vector<8x128xf32>
    %248 = arith.subf %247, %244 : vector<8x128xf32>
    %249 = arith.mulf %248, %234 : vector<8x128xf32>
    %250 = arith.addf %246, %249 : vector<8x128xf32>
    %cst_101 = arith.constant 1.800000e+00 : f32
    %251 = vector.broadcast %cst_101 : f32 to vector<8x128xf32>
    %252 = arith.mulf %251, %250 : vector<8x128xf32>
    %cst_102 = arith.constant 4.000000e-02 : f32
    %253 = vector.broadcast %cst_102 : f32 to vector<8x128xf32>
    %254 = arith.addf %253, %252 : vector<8x128xf32>
    %255 = arith.mulf %233, %240 : vector<8x128xf32>
    %cst_103 = arith.constant 1.000000e+00 : f32
    %256 = vector.broadcast %cst_103 : f32 to vector<8x128xf32>
    %257 = arith.subf %256, %240 : vector<8x128xf32>
    %258 = arith.mulf %257, %213 : vector<8x128xf32>
    %259 = arith.addf %255, %258 : vector<8x128xf32>
    %260 = arith.mulf %254, %234 : vector<8x128xf32>
    %cst_104 = arith.constant 0.00999999977 : f32
    %261 = vector.broadcast %cst_104 : f32 to vector<8x128xf32>
    %262 = arith.mulf %260, %261 : vector<8x128xf32>
    %263 = arith.subf %259, %262 : vector<8x128xf32>
    %264 = arith.subf %263, %254 : vector<8x128xf32>
    %cst_105 = arith.constant 0.000000e+00 : f32
    %265 = vector.broadcast %cst_105 : f32 to vector<8x128xf32>
    %266 = arith.cmpf ogt, %264, %265 : vector<8x128xf32>
    %267 = arith.extui %266 : vector<8x128xi1> to vector<8x128xi32>
    %268 = arith.sitofp %267 : vector<8x128xi32> to vector<8x128xf32>
    %cst_106 = arith.constant 0.990049839 : f32
    %269 = vector.broadcast %cst_106 : f32 to vector<8x128xf32>
    %270 = arith.mulf %263, %269 : vector<8x128xf32>
    %cst_107 = arith.constant 0.00995016656 : f32
    %271 = vector.broadcast %cst_107 : f32 to vector<8x128xf32>
    %272 = arith.mulf %271, %268 : vector<8x128xf32>
    %273 = arith.addf %270, %272 : vector<8x128xf32>
    %cst_108 = arith.constant 8.000000e-02 : f32
    %274 = vector.broadcast %cst_108 : f32 to vector<8x128xf32>
    %275 = arith.addf %273, %274 : vector<8x128xf32>
    %276 = arith.mulf %211, %235 : vector<8x128xf32>
    %277 = arith.mulf %234, %268 : vector<8x128xf32>
    %278 = arith.mulf %277, %275 : vector<8x128xf32>
    %279 = arith.addf %276, %278 : vector<8x128xf32>
    %280 = math.tanh %279 : vector<8x128xf32>
    %281 = arith.mulf %236, %280 : vector<8x128xf32>
    %282 = arith.index_cast %c3_i32 : i32 to index
    %c0_109 = arith.constant 0 : index
    %c0_110 = arith.constant 0 : index
    %283 = vector.load %arg5[%282, %c0_109, %c0_110] : memref<8x8x128xf32, #tpu.memory_space<vmem>>, vector<1x8x128xf32>
    %284 = vector.shape_cast %283 : vector<1x8x128xf32> to vector<8x128xf32>
    %285 = vector.shape_cast %281 : vector<8x128xf32> to vector<1x8x128xf32>
    tpu.vector_store %arg5[%282, %c0_109, %c0_110], %285 {strides = array<i32>} : memref<8x8x128xf32, #tpu.memory_space<vmem>>, vector<1x8x128xf32>,
    %c4_i32 = arith.constant 4 : i32
    %c0_111 = arith.constant 0 : index
    %c0_112 = arith.constant 0 : index
    %286 = vector.load %arg4[%c0_111, %c0_112] : memref<128x512xf32, #tpu.memory_space<vmem>>, vector<128x512xf32>
    %cst_113 = arith.constant dense<0.000000e+00> : vector<8x512xf32>
    %287 = tpu.matmul %281, %286, %cst_113 {dimension_numbers = #tpu.dot_dimension_numbers<[1], [0], [0], [1], [0, 0, 1, 1], [], []>} : vector<8x128xf32>, vector<128x512xf32>, vector<8x512xf32> -> vector<8x512xf32>
    %288 = arith.index_cast %c4_i32 : i32 to index
    %c0_114 = arith.constant 0 : index
    %c0_115 = arith.constant 0 : index
    %289 = vector.load %arg7[%288, %c0_114, %c0_115] : memref<8x8x512xf32, #tpu.memory_space<vmem>>, vector<1x8x512xf32>
    %290 = vector.shape_cast %289 : vector<1x8x512xf32> to vector<8x512xf32>
    %291 = arith.addf %287, %290 : vector<8x512xf32>
    %292 = arith.negf %291 : vector<8x512xf32>
    %293 = math.exp %292 : vector<8x512xf32>
    %cst_116 = arith.constant 1.000000e+00 : f32
    %294 = vector.broadcast %cst_116 : f32 to vector<8x512xf32>
    %295 = arith.addf %294, %293 : vector<8x512xf32>
    %296 = arith.divf %294, %295 : vector<8x512xf32>
    %297 = vector.extract_strided_slice %296 {offsets = [0, 0], sizes = [8, 128], strides = [1, 1]} : vector<8x512xf32> to vector<8x128xf32>
    %cst_117 = arith.constant 2.000000e+00 : f32
    %298 = vector.broadcast %cst_117 : f32 to vector<8x128xf32>
    %299 = arith.mulf %298, %297 : vector<8x128xf32>
    %cst_118 = arith.constant 1.000000e+00 : f32
    %300 = vector.broadcast %cst_118 : f32 to vector<8x128xf32>
    %301 = arith.subf %299, %300 : vector<8x128xf32>
    %302 = vector.extract_strided_slice %296 {offsets = [0, 128], sizes = [8, 128], strides = [1, 1]} : vector<8x512xf32> to vector<8x128xf32>
    %303 = vector.extract_strided_slice %296 {offsets = [0, 256], sizes = [8, 128], strides = [1, 1]} : vector<8x512xf32> to vector<8x128xf32>
    %304 = vector.extract_strided_slice %296 {offsets = [0, 384], sizes = [8, 128], strides = [1, 1]} : vector<8x512xf32> to vector<8x128xf32>
    %cst_119 = arith.constant -7.812500e-05 : f32
    %305 = vector.broadcast %cst_119 : f32 to vector<8x128xf32>
    %306 = arith.mulf %305, %301 : vector<8x128xf32>
    %cst_120 = arith.constant 1.000000e+00 : f32
    %307 = vector.broadcast %cst_120 : f32 to vector<8x128xf32>
    %308 = arith.addf %307, %306 : vector<8x128xf32>
    %cst_121 = arith.constant -1.562500e-04 : f32
    %309 = vector.broadcast %cst_121 : f32 to vector<8x128xf32>
    %310 = arith.mulf %309, %302 : vector<8x128xf32>
    %cst_122 = arith.constant 1.000000e+00 : f32
    %311 = vector.broadcast %cst_122 : f32 to vector<8x128xf32>
    %312 = arith.addf %311, %310 : vector<8x128xf32>
    %cst_123 = arith.constant 1.000000e-01 : f32
    %313 = vector.broadcast %cst_123 : f32 to vector<8x128xf32>
    %314 = arith.mulf %312, %313 : vector<8x128xf32>
    %cst_124 = arith.constant 1.000000e+00 : f32
    %315 = vector.broadcast %cst_124 : f32 to vector<8x128xf32>
    %316 = arith.subf %315, %312 : vector<8x128xf32>
    %317 = arith.mulf %316, %302 : vector<8x128xf32>
    %318 = arith.addf %314, %317 : vector<8x128xf32>
    %cst_125 = arith.constant 1.800000e+00 : f32
    %319 = vector.broadcast %cst_125 : f32 to vector<8x128xf32>
    %320 = arith.mulf %319, %318 : vector<8x128xf32>
    %cst_126 = arith.constant 4.000000e-02 : f32
    %321 = vector.broadcast %cst_126 : f32 to vector<8x128xf32>
    %322 = arith.addf %321, %320 : vector<8x128xf32>
    %323 = arith.mulf %301, %308 : vector<8x128xf32>
    %cst_127 = arith.constant 1.000000e+00 : f32
    %324 = vector.broadcast %cst_127 : f32 to vector<8x128xf32>
    %325 = arith.subf %324, %308 : vector<8x128xf32>
    %326 = arith.mulf %325, %281 : vector<8x128xf32>
    %327 = arith.addf %323, %326 : vector<8x128xf32>
    %328 = arith.mulf %322, %302 : vector<8x128xf32>
    %cst_128 = arith.constant 0.00999999977 : f32
    %329 = vector.broadcast %cst_128 : f32 to vector<8x128xf32>
    %330 = arith.mulf %328, %329 : vector<8x128xf32>
    %331 = arith.subf %327, %330 : vector<8x128xf32>
    %332 = arith.subf %331, %322 : vector<8x128xf32>
    %cst_129 = arith.constant 0.000000e+00 : f32
    %333 = vector.broadcast %cst_129 : f32 to vector<8x128xf32>
    %334 = arith.cmpf ogt, %332, %333 : vector<8x128xf32>
    %335 = arith.extui %334 : vector<8x128xi1> to vector<8x128xi32>
    %336 = arith.sitofp %335 : vector<8x128xi32> to vector<8x128xf32>
    %cst_130 = arith.constant 0.990049839 : f32
    %337 = vector.broadcast %cst_130 : f32 to vector<8x128xf32>
    %338 = arith.mulf %331, %337 : vector<8x128xf32>
    %cst_131 = arith.constant 0.00995016656 : f32
    %339 = vector.broadcast %cst_131 : f32 to vector<8x128xf32>
    %340 = arith.mulf %339, %336 : vector<8x128xf32>
    %341 = arith.addf %338, %340 : vector<8x128xf32>
    %cst_132 = arith.constant 8.000000e-02 : f32
    %342 = vector.broadcast %cst_132 : f32 to vector<8x128xf32>
    %343 = arith.addf %341, %342 : vector<8x128xf32>
    %344 = arith.mulf %279, %303 : vector<8x128xf32>
    %345 = arith.mulf %302, %336 : vector<8x128xf32>
    %346 = arith.mulf %345, %343 : vector<8x128xf32>
    %347 = arith.addf %344, %346 : vector<8x128xf32>
    %348 = math.tanh %347 : vector<8x128xf32>
    %349 = arith.mulf %304, %348 : vector<8x128xf32>
    %350 = arith.index_cast %c4_i32 : i32 to index
    %c0_133 = arith.constant 0 : index
    %c0_134 = arith.constant 0 : index
    %351 = vector.load %arg5[%350, %c0_133, %c0_134] : memref<8x8x128xf32, #tpu.memory_space<vmem>>, vector<1x8x128xf32>
    %352 = vector.shape_cast %351 : vector<1x8x128xf32> to vector<8x128xf32>
    %353 = vector.shape_cast %349 : vector<8x128xf32> to vector<1x8x128xf32>
    tpu.vector_store %arg5[%350, %c0_133, %c0_134], %353 {strides = array<i32>} : memref<8x8x128xf32, #tpu.memory_space<vmem>>, vector<1x8x128xf32>,
    %c5_i32 = arith.constant 5 : i32
    %c0_135 = arith.constant 0 : index
    %c0_136 = arith.constant 0 : index
    %354 = vector.load %arg4[%c0_135, %c0_136] : memref<128x512xf32, #tpu.memory_space<vmem>>, vector<128x512xf32>
    %cst_137 = arith.constant dense<0.000000e+00> : vector<8x512xf32>
    %355 = tpu.matmul %349, %354, %cst_137 {dimension_numbers = #tpu.dot_dimension_numbers<[1], [0], [0], [1], [0, 0, 1, 1], [], []>} : vector<8x128xf32>, vector<128x512xf32>, vector<8x512xf32> -> vector<8x512xf32>
    %356 = arith.index_cast %c5_i32 : i32 to index
    %c0_138 = arith.constant 0 : index
    %c0_139 = arith.constant 0 : index
    %357 = vector.load %arg7[%356, %c0_138, %c0_139] : memref<8x8x512xf32, #tpu.memory_space<vmem>>, vector<1x8x512xf32>
    %358 = vector.shape_cast %357 : vector<1x8x512xf32> to vector<8x512xf32>
    %359 = arith.addf %355, %358 : vector<8x512xf32>
    %360 = arith.negf %359 : vector<8x512xf32>
    %361 = math.exp %360 : vector<8x512xf32>
    %cst_140 = arith.constant 1.000000e+00 : f32
    %362 = vector.broadcast %cst_140 : f32 to vector<8x512xf32>
    %363 = arith.addf %362, %361 : vector<8x512xf32>
    %364 = arith.divf %362, %363 : vector<8x512xf32>
    %365 = vector.extract_strided_slice %364 {offsets = [0, 0], sizes = [8, 128], strides = [1, 1]} : vector<8x512xf32> to vector<8x128xf32>
    %cst_141 = arith.constant 2.000000e+00 : f32
    %366 = vector.broadcast %cst_141 : f32 to vector<8x128xf32>
    %367 = arith.mulf %366, %365 : vector<8x128xf32>
    %cst_142 = arith.constant 1.000000e+00 : f32
    %368 = vector.broadcast %cst_142 : f32 to vector<8x128xf32>
    %369 = arith.subf %367, %368 : vector<8x128xf32>
    %370 = vector.extract_strided_slice %364 {offsets = [0, 128], sizes = [8, 128], strides = [1, 1]} : vector<8x512xf32> to vector<8x128xf32>
    %371 = vector.extract_strided_slice %364 {offsets = [0, 256], sizes = [8, 128], strides = [1, 1]} : vector<8x512xf32> to vector<8x128xf32>
    %372 = vector.extract_strided_slice %364 {offsets = [0, 384], sizes = [8, 128], strides = [1, 1]} : vector<8x512xf32> to vector<8x128xf32>
    %cst_143 = arith.constant -7.812500e-05 : f32
    %373 = vector.broadcast %cst_143 : f32 to vector<8x128xf32>
    %374 = arith.mulf %373, %369 : vector<8x128xf32>
    %cst_144 = arith.constant 1.000000e+00 : f32
    %375 = vector.broadcast %cst_144 : f32 to vector<8x128xf32>
    %376 = arith.addf %375, %374 : vector<8x128xf32>
    %cst_145 = arith.constant -1.562500e-04 : f32
    %377 = vector.broadcast %cst_145 : f32 to vector<8x128xf32>
    %378 = arith.mulf %377, %370 : vector<8x128xf32>
    %cst_146 = arith.constant 1.000000e+00 : f32
    %379 = vector.broadcast %cst_146 : f32 to vector<8x128xf32>
    %380 = arith.addf %379, %378 : vector<8x128xf32>
    %cst_147 = arith.constant 1.000000e-01 : f32
    %381 = vector.broadcast %cst_147 : f32 to vector<8x128xf32>
    %382 = arith.mulf %380, %381 : vector<8x128xf32>
    %cst_148 = arith.constant 1.000000e+00 : f32
    %383 = vector.broadcast %cst_148 : f32 to vector<8x128xf32>
    %384 = arith.subf %383, %380 : vector<8x128xf32>
    %385 = arith.mulf %384, %370 : vector<8x128xf32>
    %386 = arith.addf %382, %385 : vector<8x128xf32>
    %cst_149 = arith.constant 1.800000e+00 : f32
    %387 = vector.broadcast %cst_149 : f32 to vector<8x128xf32>
    %388 = arith.mulf %387, %386 : vector<8x128xf32>
    %cst_150 = arith.constant 4.000000e-02 : f32
    %389 = vector.broadcast %cst_150 : f32 to vector<8x128xf32>
    %390 = arith.addf %389, %388 : vector<8x128xf32>
    %391 = arith.mulf %369, %376 : vector<8x128xf32>
    %cst_151 = arith.constant 1.000000e+00 : f32
    %392 = vector.broadcast %cst_151 : f32 to vector<8x128xf32>
    %393 = arith.subf %392, %376 : vector<8x128xf32>
    %394 = arith.mulf %393, %349 : vector<8x128xf32>
    %395 = arith.addf %391, %394 : vector<8x128xf32>
    %396 = arith.mulf %390, %370 : vector<8x128xf32>
    %cst_152 = arith.constant 0.00999999977 : f32
    %397 = vector.broadcast %cst_152 : f32 to vector<8x128xf32>
    %398 = arith.mulf %396, %397 : vector<8x128xf32>
    %399 = arith.subf %395, %398 : vector<8x128xf32>
    %400 = arith.subf %399, %390 : vector<8x128xf32>
    %cst_153 = arith.constant 0.000000e+00 : f32
    %401 = vector.broadcast %cst_153 : f32 to vector<8x128xf32>
    %402 = arith.cmpf ogt, %400, %401 : vector<8x128xf32>
    %403 = arith.extui %402 : vector<8x128xi1> to vector<8x128xi32>
    %404 = arith.sitofp %403 : vector<8x128xi32> to vector<8x128xf32>
    %cst_154 = arith.constant 0.990049839 : f32
    %405 = vector.broadcast %cst_154 : f32 to vector<8x128xf32>
    %406 = arith.mulf %399, %405 : vector<8x128xf32>
    %cst_155 = arith.constant 0.00995016656 : f32
    %407 = vector.broadcast %cst_155 : f32 to vector<8x128xf32>
    %408 = arith.mulf %407, %404 : vector<8x128xf32>
    %409 = arith.addf %406, %408 : vector<8x128xf32>
    %cst_156 = arith.constant 8.000000e-02 : f32
    %410 = vector.broadcast %cst_156 : f32 to vector<8x128xf32>
    %411 = arith.addf %409, %410 : vector<8x128xf32>
    %412 = arith.mulf %347, %371 : vector<8x128xf32>
    %413 = arith.mulf %370, %404 : vector<8x128xf32>
    %414 = arith.mulf %413, %411 : vector<8x128xf32>
    %415 = arith.addf %412, %414 : vector<8x128xf32>
    %416 = math.tanh %415 : vector<8x128xf32>
    %417 = arith.mulf %372, %416 : vector<8x128xf32>
    %418 = arith.index_cast %c5_i32 : i32 to index
    %c0_157 = arith.constant 0 : index
    %c0_158 = arith.constant 0 : index
    %419 = vector.load %arg5[%418, %c0_157, %c0_158] : memref<8x8x128xf32, #tpu.memory_space<vmem>>, vector<1x8x128xf32>
    %420 = vector.shape_cast %419 : vector<1x8x128xf32> to vector<8x128xf32>
    %421 = vector.shape_cast %417 : vector<8x128xf32> to vector<1x8x128xf32>
    tpu.vector_store %arg5[%418, %c0_157, %c0_158], %421 {strides = array<i32>} : memref<8x8x128xf32, #tpu.memory_space<vmem>>, vector<1x8x128xf32>,
    %c6_i32 = arith.constant 6 : i32
    %c0_159 = arith.constant 0 : index
    %c0_160 = arith.constant 0 : index
    %422 = vector.load %arg4[%c0_159, %c0_160] : memref<128x512xf32, #tpu.memory_space<vmem>>, vector<128x512xf32>
    %cst_161 = arith.constant dense<0.000000e+00> : vector<8x512xf32>
    %423 = tpu.matmul %417, %422, %cst_161 {dimension_numbers = #tpu.dot_dimension_numbers<[1], [0], [0], [1], [0, 0, 1, 1], [], []>} : vector<8x128xf32>, vector<128x512xf32>, vector<8x512xf32> -> vector<8x512xf32>
    %424 = arith.index_cast %c6_i32 : i32 to index
    %c0_162 = arith.constant 0 : index
    %c0_163 = arith.constant 0 : index
    %425 = vector.load %arg7[%424, %c0_162, %c0_163] : memref<8x8x512xf32, #tpu.memory_space<vmem>>, vector<1x8x512xf32>
    %426 = vector.shape_cast %425 : vector<1x8x512xf32> to vector<8x512xf32>
    %427 = arith.addf %423, %426 : vector<8x512xf32>
    %428 = arith.negf %427 : vector<8x512xf32>
    %429 = math.exp %428 : vector<8x512xf32>
    %cst_164 = arith.constant 1.000000e+00 : f32
    %430 = vector.broadcast %cst_164 : f32 to vector<8x512xf32>
    %431 = arith.addf %430, %429 : vector<8x512xf32>
    %432 = arith.divf %430, %431 : vector<8x512xf32>
    %433 = vector.extract_strided_slice %432 {offsets = [0, 0], sizes = [8, 128], strides = [1, 1]} : vector<8x512xf32> to vector<8x128xf32>
    %cst_165 = arith.constant 2.000000e+00 : f32
    %434 = vector.broadcast %cst_165 : f32 to vector<8x128xf32>
    %435 = arith.mulf %434, %433 : vector<8x128xf32>
    %cst_166 = arith.constant 1.000000e+00 : f32
    %436 = vector.broadcast %cst_166 : f32 to vector<8x128xf32>
    %437 = arith.subf %435, %436 : vector<8x128xf32>
    %438 = vector.extract_strided_slice %432 {offsets = [0, 128], sizes = [8, 128], strides = [1, 1]} : vector<8x512xf32> to vector<8x128xf32>
    %439 = vector.extract_strided_slice %432 {offsets = [0, 256], sizes = [8, 128], strides = [1, 1]} : vector<8x512xf32> to vector<8x128xf32>
    %440 = vector.extract_strided_slice %432 {offsets = [0, 384], sizes = [8, 128], strides = [1, 1]} : vector<8x512xf32> to vector<8x128xf32>
    %cst_167 = arith.constant -7.812500e-05 : f32
    %441 = vector.broadcast %cst_167 : f32 to vector<8x128xf32>
    %442 = arith.mulf %441, %437 : vector<8x128xf32>
    %cst_168 = arith.constant 1.000000e+00 : f32
    %443 = vector.broadcast %cst_168 : f32 to vector<8x128xf32>
    %444 = arith.addf %443, %442 : vector<8x128xf32>
    %cst_169 = arith.constant -1.562500e-04 : f32
    %445 = vector.broadcast %cst_169 : f32 to vector<8x128xf32>
    %446 = arith.mulf %445, %438 : vector<8x128xf32>
    %cst_170 = arith.constant 1.000000e+00 : f32
    %447 = vector.broadcast %cst_170 : f32 to vector<8x128xf32>
    %448 = arith.addf %447, %446 : vector<8x128xf32>
    %cst_171 = arith.constant 1.000000e-01 : f32
    %449 = vector.broadcast %cst_171 : f32 to vector<8x128xf32>
    %450 = arith.mulf %448, %449 : vector<8x128xf32>
    %cst_172 = arith.constant 1.000000e+00 : f32
    %451 = vector.broadcast %cst_172 : f32 to vector<8x128xf32>
    %452 = arith.subf %451, %448 : vector<8x128xf32>
    %453 = arith.mulf %452, %438 : vector<8x128xf32>
    %454 = arith.addf %450, %453 : vector<8x128xf32>
    %cst_173 = arith.constant 1.800000e+00 : f32
    %455 = vector.broadcast %cst_173 : f32 to vector<8x128xf32>
    %456 = arith.mulf %455, %454 : vector<8x128xf32>
    %cst_174 = arith.constant 4.000000e-02 : f32
    %457 = vector.broadcast %cst_174 : f32 to vector<8x128xf32>
    %458 = arith.addf %457, %456 : vector<8x128xf32>
    %459 = arith.mulf %437, %444 : vector<8x128xf32>
    %cst_175 = arith.constant 1.000000e+00 : f32
    %460 = vector.broadcast %cst_175 : f32 to vector<8x128xf32>
    %461 = arith.subf %460, %444 : vector<8x128xf32>
    %462 = arith.mulf %461, %417 : vector<8x128xf32>
    %463 = arith.addf %459, %462 : vector<8x128xf32>
    %464 = arith.mulf %458, %438 : vector<8x128xf32>
    %cst_176 = arith.constant 0.00999999977 : f32
    %465 = vector.broadcast %cst_176 : f32 to vector<8x128xf32>
    %466 = arith.mulf %464, %465 : vector<8x128xf32>
    %467 = arith.subf %463, %466 : vector<8x128xf32>
    %468 = arith.subf %467, %458 : vector<8x128xf32>
    %cst_177 = arith.constant 0.000000e+00 : f32
    %469 = vector.broadcast %cst_177 : f32 to vector<8x128xf32>
    %470 = arith.cmpf ogt, %468, %469 : vector<8x128xf32>
    %471 = arith.extui %470 : vector<8x128xi1> to vector<8x128xi32>
    %472 = arith.sitofp %471 : vector<8x128xi32> to vector<8x128xf32>
    %cst_178 = arith.constant 0.990049839 : f32
    %473 = vector.broadcast %cst_178 : f32 to vector<8x128xf32>
    %474 = arith.mulf %467, %473 : vector<8x128xf32>
    %cst_179 = arith.constant 0.00995016656 : f32
    %475 = vector.broadcast %cst_179 : f32 to vector<8x128xf32>
    %476 = arith.mulf %475, %472 : vector<8x128xf32>
    %477 = arith.addf %474, %476 : vector<8x128xf32>
    %cst_180 = arith.constant 8.000000e-02 : f32
    %478 = vector.broadcast %cst_180 : f32 to vector<8x128xf32>
    %479 = arith.addf %477, %478 : vector<8x128xf32>
    %480 = arith.mulf %415, %439 : vector<8x128xf32>
    %481 = arith.mulf %438, %472 : vector<8x128xf32>
    %482 = arith.mulf %481, %479 : vector<8x128xf32>
    %483 = arith.addf %480, %482 : vector<8x128xf32>
    %484 = math.tanh %483 : vector<8x128xf32>
    %485 = arith.mulf %440, %484 : vector<8x128xf32>
    %486 = arith.index_cast %c6_i32 : i32 to index
    %c0_181 = arith.constant 0 : index
    %c0_182 = arith.constant 0 : index
    %487 = vector.load %arg5[%486, %c0_181, %c0_182] : memref<8x8x128xf32, #tpu.memory_space<vmem>>, vector<1x8x128xf32>
    %488 = vector.shape_cast %487 : vector<1x8x128xf32> to vector<8x128xf32>
    %489 = vector.shape_cast %485 : vector<8x128xf32> to vector<1x8x128xf32>
    tpu.vector_store %arg5[%486, %c0_181, %c0_182], %489 {strides = array<i32>} : memref<8x8x128xf32, #tpu.memory_space<vmem>>, vector<1x8x128xf32>,
    %c7_i32 = arith.constant 7 : i32
    %c0_183 = arith.constant 0 : index
    %c0_184 = arith.constant 0 : index
    %490 = vector.load %arg4[%c0_183, %c0_184] : memref<128x512xf32, #tpu.memory_space<vmem>>, vector<128x512xf32>
    %cst_185 = arith.constant dense<0.000000e+00> : vector<8x512xf32>
    %491 = tpu.matmul %485, %490, %cst_185 {dimension_numbers = #tpu.dot_dimension_numbers<[1], [0], [0], [1], [0, 0, 1, 1], [], []>} : vector<8x128xf32>, vector<128x512xf32>, vector<8x512xf32> -> vector<8x512xf32>
    %492 = arith.index_cast %c7_i32 : i32 to index
    %c0_186 = arith.constant 0 : index
    %c0_187 = arith.constant 0 : index
    %493 = vector.load %arg7[%492, %c0_186, %c0_187] : memref<8x8x512xf32, #tpu.memory_space<vmem>>, vector<1x8x512xf32>
    %494 = vector.shape_cast %493 : vector<1x8x512xf32> to vector<8x512xf32>
    %495 = arith.addf %491, %494 : vector<8x512xf32>
    %496 = arith.negf %495 : vector<8x512xf32>
    %497 = math.exp %496 : vector<8x512xf32>
    %cst_188 = arith.constant 1.000000e+00 : f32
    %498 = vector.broadcast %cst_188 : f32 to vector<8x512xf32>
    %499 = arith.addf %498, %497 : vector<8x512xf32>
    %500 = arith.divf %498, %499 : vector<8x512xf32>
    %501 = vector.extract_strided_slice %500 {offsets = [0, 0], sizes = [8, 128], strides = [1, 1]} : vector<8x512xf32> to vector<8x128xf32>
    %cst_189 = arith.constant 2.000000e+00 : f32
    %502 = vector.broadcast %cst_189 : f32 to vector<8x128xf32>
    %503 = arith.mulf %502, %501 : vector<8x128xf32>
    %cst_190 = arith.constant 1.000000e+00 : f32
    %504 = vector.broadcast %cst_190 : f32 to vector<8x128xf32>
    %505 = arith.subf %503, %504 : vector<8x128xf32>
    %506 = vector.extract_strided_slice %500 {offsets = [0, 128], sizes = [8, 128], strides = [1, 1]} : vector<8x512xf32> to vector<8x128xf32>
    %507 = vector.extract_strided_slice %500 {offsets = [0, 256], sizes = [8, 128], strides = [1, 1]} : vector<8x512xf32> to vector<8x128xf32>
    %508 = vector.extract_strided_slice %500 {offsets = [0, 384], sizes = [8, 128], strides = [1, 1]} : vector<8x512xf32> to vector<8x128xf32>
    %cst_191 = arith.constant -7.812500e-05 : f32
    %509 = vector.broadcast %cst_191 : f32 to vector<8x128xf32>
    %510 = arith.mulf %509, %505 : vector<8x128xf32>
    %cst_192 = arith.constant 1.000000e+00 : f32
    %511 = vector.broadcast %cst_192 : f32 to vector<8x128xf32>
    %512 = arith.addf %511, %510 : vector<8x128xf32>
    %cst_193 = arith.constant -1.562500e-04 : f32
    %513 = vector.broadcast %cst_193 : f32 to vector<8x128xf32>
    %514 = arith.mulf %513, %506 : vector<8x128xf32>
    %cst_194 = arith.constant 1.000000e+00 : f32
    %515 = vector.broadcast %cst_194 : f32 to vector<8x128xf32>
    %516 = arith.addf %515, %514 : vector<8x128xf32>
    %cst_195 = arith.constant 1.000000e-01 : f32
    %517 = vector.broadcast %cst_195 : f32 to vector<8x128xf32>
    %518 = arith.mulf %516, %517 : vector<8x128xf32>
    %cst_196 = arith.constant 1.000000e+00 : f32
    %519 = vector.broadcast %cst_196 : f32 to vector<8x128xf32>
    %520 = arith.subf %519, %516 : vector<8x128xf32>
    %521 = arith.mulf %520, %506 : vector<8x128xf32>
    %522 = arith.addf %518, %521 : vector<8x128xf32>
    %cst_197 = arith.constant 1.800000e+00 : f32
    %523 = vector.broadcast %cst_197 : f32 to vector<8x128xf32>
    %524 = arith.mulf %523, %522 : vector<8x128xf32>
    %cst_198 = arith.constant 4.000000e-02 : f32
    %525 = vector.broadcast %cst_198 : f32 to vector<8x128xf32>
    %526 = arith.addf %525, %524 : vector<8x128xf32>
    %527 = arith.mulf %505, %512 : vector<8x128xf32>
    %cst_199 = arith.constant 1.000000e+00 : f32
    %528 = vector.broadcast %cst_199 : f32 to vector<8x128xf32>
    %529 = arith.subf %528, %512 : vector<8x128xf32>
    %530 = arith.mulf %529, %485 : vector<8x128xf32>
    %531 = arith.addf %527, %530 : vector<8x128xf32>
    %532 = arith.mulf %526, %506 : vector<8x128xf32>
    %cst_200 = arith.constant 0.00999999977 : f32
    %533 = vector.broadcast %cst_200 : f32 to vector<8x128xf32>
    %534 = arith.mulf %532, %533 : vector<8x128xf32>
    %535 = arith.subf %531, %534 : vector<8x128xf32>
    %536 = arith.subf %535, %526 : vector<8x128xf32>
    %cst_201 = arith.constant 0.000000e+00 : f32
    %537 = vector.broadcast %cst_201 : f32 to vector<8x128xf32>
    %538 = arith.cmpf ogt, %536, %537 : vector<8x128xf32>
    %539 = arith.extui %538 : vector<8x128xi1> to vector<8x128xi32>
    %540 = arith.sitofp %539 : vector<8x128xi32> to vector<8x128xf32>
    %cst_202 = arith.constant 0.990049839 : f32
    %541 = vector.broadcast %cst_202 : f32 to vector<8x128xf32>
    %542 = arith.mulf %535, %541 : vector<8x128xf32>
    %cst_203 = arith.constant 0.00995016656 : f32
    %543 = vector.broadcast %cst_203 : f32 to vector<8x128xf32>
    %544 = arith.mulf %543, %540 : vector<8x128xf32>
    %545 = arith.addf %542, %544 : vector<8x128xf32>
    %cst_204 = arith.constant 8.000000e-02 : f32
    %546 = vector.broadcast %cst_204 : f32 to vector<8x128xf32>
    %547 = arith.addf %545, %546 : vector<8x128xf32>
    %548 = arith.mulf %483, %507 : vector<8x128xf32>
    %549 = arith.mulf %506, %540 : vector<8x128xf32>
    %550 = arith.mulf %549, %547 : vector<8x128xf32>
    %551 = arith.addf %548, %550 : vector<8x128xf32>
    %552 = math.tanh %551 : vector<8x128xf32>
    %553 = arith.mulf %508, %552 : vector<8x128xf32>
    %554 = arith.index_cast %c7_i32 : i32 to index
    %c0_205 = arith.constant 0 : index
    %c0_206 = arith.constant 0 : index
    %555 = vector.load %arg5[%554, %c0_205, %c0_206] : memref<8x8x128xf32, #tpu.memory_space<vmem>>, vector<1x8x128xf32>
    %556 = vector.shape_cast %555 : vector<1x8x128xf32> to vector<8x128xf32>
    %557 = vector.shape_cast %553 : vector<8x128xf32> to vector<1x8x128xf32>
    tpu.vector_store %arg5[%554, %c0_205, %c0_206], %557 {strides = array<i32>} : memref<8x8x128xf32, #tpu.memory_space<vmem>>, vector<1x8x128xf32>,
    %c8_i32 = arith.constant 8 : i32
    %c0_207 = arith.constant 0 : index
    %c0_208 = arith.constant 0 : index
    %558 = vector.load %arg8[%c0_207, %c0_208] : memref<8x128xf32, #tpu.memory_space<vmem>>, vector<8x128xf32>
    tpu.vector_store %arg8[%c0_207, %c0_208], %553 {strides = array<i32>} : memref<8x128xf32, #tpu.memory_space<vmem>>, vector<8x128xf32>,
    %c0_209 = arith.constant 0 : index
    %c0_210 = arith.constant 0 : index
    %559 = vector.load %arg9[%c0_209, %c0_210] : memref<8x128xf32, #tpu.memory_space<vmem>>, vector<8x128xf32>
    tpu.vector_store %arg9[%c0_209, %c0_210], %551 {strides = array<i32>} : memref<8x128xf32, #tpu.memory_space<vmem>>, vector<8x128xf32>,
    %c0_211 = arith.constant 0 : index
    %c0_212 = arith.constant 0 : index
    %560 = vector.load %arg6[%c0_211, %c0_212] : memref<8x128xf32, #tpu.memory_space<vmem>>, vector<8x128xf32>
    tpu.vector_store %arg6[%c0_211, %c0_212], %551 {strides = array<i32>} : memref<8x128xf32, #tpu.memory_space<vmem>>, vector<8x128xf32>,
    return
  }
  func.func @transform_0(%arg0: i32) -> (i32, i32, i32) {
    %c0_i32 = arith.constant 0 : i32
    %c0_i32_0 = arith.constant 0 : i32
    %c0_i32_1 = arith.constant 0 : i32
    return %arg0, %c0_i32, %c0_i32_0 : i32, i32, i32
  }
  func.func @transform_1(%arg0: i32) -> (i32, i32) {
    %c0_i32 = arith.constant 0 : i32
    %c0_i32_0 = arith.constant 0 : i32
    %c0_i32_1 = arith.constant 0 : i32
    return %c0_i32, %c0_i32_0 : i32, i32
  }
  func.func @transform_2(%arg0: i32) -> (i32, i32) {
    %c0_i32 = arith.constant 0 : i32
    %c0_i32_0 = arith.constant 0 : i32
    %c0_i32_1 = arith.constant 0 : i32
    return %c0_i32, %c0_i32_0 : i32, i32
  }
  func.func @transform_3(%arg0: i32) -> (i32, i32) {
    %c0_i32 = arith.constant 0 : i32
    %c0_i32_0 = arith.constant 0 : i32
    %c0_i32_1 = arith.constant 0 : i32
    return %c0_i32, %c0_i32_0 : i32, i32
  }
  func.func @transform_4(%arg0: i32) -> (i32, i32, i32) {
    %c0_i32 = arith.constant 0 : i32
    %c0_i32_0 = arith.constant 0 : i32
    %c0_i32_1 = arith.constant 0 : i32
    return %arg0, %c0_i32, %c0_i32_0 : i32, i32, i32
  }
  func.func @transform_5(%arg0: i32) -> (i32, i32) {
    %c0_i32 = arith.constant 0 : i32
    %c0_i32_0 = arith.constant 0 : i32
    %c0_i32_1 = arith.constant 0 : i32
    return %c0_i32, %c0_i32_0 : i32, i32
  }
}

</mosaic_0001>

<bundles_post_ra>
// kernel: eslstm_forward.1
= control target key start
LH: loop header
LB: loop body
LE: loop exit
PB: predicated region body
PF: predicated region fallthrough
CT: control target
= control target key end

     0   :  { %vm86_vm0 = vcmask 1043456   ;;  %v3322_v2 = vmov 0.0   ;;  %vm61_vm1 = vcmask 31744   ;;  %s4603_s1 = inlined_call_operand.vmem [shape: f32[4,512], index: 1, kind: input, shape index: {}]   ;;  %s4604_s0 = inlined_call_operand.vmem [shape: f32[8,8,4], index: 0, kind: input, shape index: {}]   ;;  %s4605_s3 = inlined_call_operand.vmem [shape: f32[128,512], index: 3, kind: input, shape index: {}]   ;;  %s4606_s2 = inlined_call_operand.vmem [shape: f32[1,512], index: 2, kind: input, shape index: {}]   ;;  %s4607_s4 = inlined_call_operand.vmem [shape: f32[8,8,128], index: 4, kind: output, shape index: {0}]   ;;  %s4608_s5 = inlined_call_operand.vmem [shape: f32[8,128], index: 5, kind: output, shape index: {1}]  }
   0x1   :  { %v33_v0 = vld [vmem:[%s4603_s1] sm:$0xff]  ;;  %v34_v1 = vld [vmem:[%s4603_s1 + $0x8] sm:$0xff]  ;;  %159 = vmatprep.mubr.f32.mxu0 %v3322_v2  ;;  %272 = vmatprep.mubr.f32.mxu1 %v3322_v2  ;;  %v358_v8 = vld [vmem:[%s4605_s3 + $0x18] sm:$0xff] }
   0x2   :  { %v25_v3 = vld [vmem:[%s4604_s0] sm:$0xff]  ;;  %v59_v4 = vcombine.high %v33_v0, %v33_v0  ;;  %v60_v5 = vcombine.high %v34_v1, %v34_v1  ;;  %v356_v6 = vld [vmem:[%s4605_s3 + $0x8] sm:$0xff]  ;;  %v362_v10 = vld [vmem:[%s4605_s3 + $0x38] sm:$0xff] }
   0x3   :  { %v360_v7 = vld [vmem:[%s4605_s3 + $0x28] sm:$0xff]  ;;  %v355_v11 = vld [vmem:[%s4605_s3] sm:$0xff]  ;;  %v3386_v13 = vpack.c.bf16 %v362_v10, %v358_v8  ;;  %v357_v15 = vld [vmem:[%s4605_s3 + $0x10] sm:$0xff] }
   0x4   :  { %v3373_v9 = vpack.c.bf16 %v360_v7, %v356_v6  ;;  %v359_v12 = vld [vmem:[%s4605_s3 + $0x20] sm:$0xff]  ;;  %2524 = vmatprep.subr.msk.mxu0 %vm86_vm0, %v59_v4  ;;  %2534 = vmatprep.subr.msk.mxu1 %vm86_vm0, %v60_v5  ;;  %v361_v16 = vld [vmem:[%s4605_s3 + $0x30] sm:$0xff]  ;;  %v364_v18 = vld [vmem:[%s4605_s3 + $0x48] sm:$0xff] }
   0x5   :  { %v3388_v14 = vpack.c.bf16 %v359_v12, %v355_v11  ;;  %2525 = vmatpush1.msk.msra.mxu0 %vm86_vm0, %v33_v0  ;;  %2535 = vmatpush1.msk.msra.mxu1 %vm86_vm0, %v34_v1  ;;  %v3398_v17 = vpack.c.bf16 %v361_v16, %v357_v15  ;;  %v368_v19 = vld [vmem:[%s4605_s3 + $0x68] sm:$0xff]  ;;  %v366_v20 = vld [vmem:[%s4605_s3 + $0x58] sm:$0xff]  ;;  %v363_v22 = vld [vmem:[%s4605_s3 + $0x40] sm:$0xff] }
   0x6   :  { %2526 = vmatmul.mubr.msk.f32.vlgmr.msra.gmra.mrb[0].mxu0 %vm61_vm1, %v25_v3  ;;  %2536 = vmatmul.mubr.msk.f32.vlgmr.msra.gmra.mrb[0].mxu1 %vm61_vm1, %v25_v3  ;;  %v370_v21 = vld [vmem:[%s4605_s3 + $0x78] sm:$0xff]  ;;  %v367_v23 = vld [vmem:[%s4605_s3 + $0x60] sm:$0xff]  ;;  %v26_v24 = vld [vmem:[%s4604_s0 + $0x8] sm:$0xff]  ;;  %v3425_v25 = vpack.c.bf16 %v368_v19, %v364_v18 }
   0x7   :  { %2600 = vmatprep.subr.bf16.mxu0 %v3373_v9  ;;  %2632 = vmatprep.subr.bf16.mxu1 %v3386_v13  ;;  %v3427_v26 = vpack.c.bf16 %v370_v21, %v366_v20  ;;  %v365_v27 = vld [vmem:[%s4605_s3 + $0x50] sm:$0xff]  ;;  %v3437_v29 = vpack.c.bf16 %v367_v23, %v363_v22  ;;  %v372_v31 = vld [vmem:[%s4605_s3 + $0x88] sm:$0xff]  ;;  %v374_v33 = vld [vmem:[%s4605_s3 + $0x98] sm:$0xff] }
   0x8   :  { %v369_v28 = vld [vmem:[%s4605_s3 + $0x70] sm:$0xff]  ;;  %2602 = vmatpush1.bf16.msra.mxu0 %v3388_v14  ;;  %2634 = vmatpush1.bf16.msra.mxu1 %v3398_v17  ;;  %v376_v32 = vld [vmem:[%s4605_s3 + $0xa8] sm:$0xff]  ;;  %v378_v34 = vld [vmem:[%s4605_s3 + $0xb8] sm:$0xff] }
   0x9   :  { %v3439_v30 = vpack.c.bf16 %v369_v28, %v365_v27  ;;  %165 = vmatprep.mubr.f32.mxu0 %v3322_v2  ;;  %278 = vmatprep.mubr.f32.mxu1 %v3322_v2  ;;  %v371_v35 = vld [vmem:[%s4605_s3 + $0x80] sm:$0xff]  ;;  %v373_v37 = vld [vmem:[%s4605_s3 + $0x90] sm:$0xff]  ;;  %v3474_v40 = vpack.c.bf16 %v376_v32, %v372_v31  ;;  %v3476_v41 = vpack.c.bf16 %v378_v34, %v374_v33  ;;  %v380_v42 = vld [vmem:[%s4605_s3 + $0xc8] sm:$0xff] }
   0xa   :  { %v375_v36 = vld [vmem:[%s4605_s3 + $0xa0] sm:$0xff]  ;;  %2527 = vmatmul.mubr.msk.f32.gmra.mrb[2].mxu0 %vm61_vm1, %v26_v24  ;;  %2537 = vmatmul.mubr.msk.f32.gmra.mrb[2].mxu1 %vm61_vm1, %v26_v24  ;;  %v377_v38 = vld [vmem:[%s4605_s3 + $0xb0] sm:$0xff]  ;;  %v384_v43 = vld [vmem:[%s4605_s3 + $0xe8] sm:$0xff] }
   0xb   :  { %2604 = vmatprep.subr.bf16.mxu0 %v3425_v25  ;;  %2636 = vmatprep.subr.bf16.mxu1 %v3427_v26  ;;  %v27_v39 = vld [vmem:[%s4604_s0 + $0x10] sm:$0xff]  ;;  %v3486_v44 = vpack.c.bf16 %v375_v36, %v371_v35  ;;  %v3488_v45 = vpack.c.bf16 %v377_v38, %v373_v37  ;;  %v382_v46 = vld [vmem:[%s4605_s3 + $0xd8] sm:$0xff]  ;;  %v379_v48 = vld [vmem:[%s4605_s3 + $0xc0] sm:$0xff]  ;;  %v3517_v53 = vpack.c.bf16 %v384_v43, %v380_v42 }
   0xc   :  { %2606 = vmatpush1.bf16.msra.mxu0 %v3437_v29  ;;  %2638 = vmatpush1.bf16.msra.mxu1 %v3439_v30  ;;  %v386_v47 = vld [vmem:[%s4605_s3 + $0xf8] sm:$0xff]  ;;  %v383_v49 = vld [vmem:[%s4605_s3 + $0xe0] sm:$0xff]  ;;  %v381_v50 = vld [vmem:[%s4605_s3 + $0xd0] sm:$0xff] }
   0xd   :  { %171 = vmatprep.mubr.f32.mxu0 %v3322_v2  ;;  %284 = vmatprep.mubr.f32.mxu1 %v3322_v2  ;;  %v385_v51 = vld [vmem:[%s4605_s3 + $0xf0] sm:$0xff]  ;;  %v28_v52 = vld [vmem:[%s4604_s0 + $0x18] sm:$0xff]  ;;  %v3519_v54 = vpack.c.bf16 %v386_v47, %v382_v46  ;;  %v388_v55 = vld [vmem:[%s4605_s3 + $0x108] sm:$0xff]  ;;  %v3529_v57 = vpack.c.bf16 %v383_v49, %v379_v48 }
   0xe   :  { %2528 = vmatmul.mubr.msk.f32.gmra.mrb[4].mxu0 %vm61_vm1, %v27_v39  ;;  %2538 = vmatmul.mubr.msk.f32.gmra.mrb[4].mxu1 %vm61_vm1, %v27_v39  ;;  %v392_v56 = vld [vmem:[%s4605_s3 + $0x128] sm:$0xff]  ;;  %v3531_v58 = vpack.c.bf16 %v385_v51, %v381_v50  ;;  %v390_v59 = vld [vmem:[%s4605_s3 + $0x118] sm:$0xff]  ;;  %v387_v61 = vld [vmem:[%s4605_s3 + $0x100] sm:$0xff] }
   0xf   :  { %2608 = vmatprep.subr.bf16.mxu0 %v3474_v40  ;;  %2640 = vmatprep.subr.bf16.mxu1 %v3476_v41  ;;  %v394_v60 = vld [vmem:[%s4605_s3 + $0x138] sm:$0xff]  ;;  %v391_v62 = vld [vmem:[%s4605_s3 + $0x120] sm:$0xff]  ;;  %v389_v63 = vld [vmem:[%s4605_s3 + $0x110] sm:$0xff]  ;;  %v3560_v3 = vpack.c.bf16 %v392_v56, %v388_v55 }
  0x10   :  { %2610 = vmatpush1.bf16.msra.mxu0 %v3486_v44  ;;  %2642 = vmatpush1.bf16.msra.mxu1 %v3488_v45  ;;  %v393_v0 = vld [vmem:[%s4605_s3 + $0x130] sm:$0xff]  ;;  %v29_v1 = vld [vmem:[%s4604_s0 + $0x20] sm:$0xff]  ;;  %v3562_v4 = vpack.c.bf16 %v394_v60, %v390_v59  ;;  %v396_v5 = vld [vmem:[%s4605_s3 + $0x148] sm:$0xff]  ;;  %v3572_v7 = vpack.c.bf16 %v391_v62, %v387_v61  ;;  %v37_v62 = vlaneseq }
  0x11   :  { %177 = vmatprep.mubr.f32.mxu0 %v3322_v2  ;;  %290 = vmatprep.mubr.f32.mxu1 %v3322_v2  ;;  %v400_v6 = vld [vmem:[%s4605_s3 + $0x168] sm:$0xff]  ;;  %v3574_v8 = vpack.c.bf16 %v393_v0, %v389_v63  ;;  %v398_v10 = vld [vmem:[%s4605_s3 + $0x158] sm:$0xff]  ;;  %v395_v12 = vld [vmem:[%s4605_s3 + $0x140] sm:$0xff] }
  0x12   :  { %2529 = vmatmul.mubr.msk.f32.gmra.mrb[6].mxu0 %vm61_vm1, %v28_v52  ;;  %2539 = vmatmul.mubr.msk.f32.gmra.mrb[6].mxu1 %vm61_vm1, %v28_v52  ;;  %v402_v11 = vld [vmem:[%s4605_s3 + $0x178] sm:$0xff]  ;;  %v399_v15 = vld [vmem:[%s4605_s3 + $0x160] sm:$0xff]  ;;  %v397_v16 = vld [vmem:[%s4605_s3 + $0x150] sm:$0xff]  ;;  %v3603_v20 = vpack.c.bf16 %v400_v6, %v396_v5  ;;  %v38_v63 = vshrl.u32 %v37_v62, 7 }
  0x13   :  { %2612 = vmatprep.subr.bf16.mxu0 %v3517_v53  ;;  %2644 = vmatprep.subr.bf16.mxu1 %v3519_v54  ;;  %v401_v18 = vld [vmem:[%s4605_s3 + $0x170] sm:$0xff]  ;;  %v30_v19 = vld [vmem:[%s4604_s0 + $0x28] sm:$0xff]  ;;  %v3605_v21 = vpack.c.bf16 %v402_v11, %v398_v10  ;;  %v3615_v24 = vpack.c.bf16 %v399_v15, %v395_v12  ;;  %v406_v28 = vld [vmem:[%s4605_s3 + $0x198] sm:$0xff] }
  0x14   :  { %2614 = vmatpush1.bf16.msra.mxu0 %v3529_v57  ;;  %2646 = vmatpush1.bf16.msra.mxu1 %v3531_v58  ;;  %v404_v22 = vld [vmem:[%s4605_s3 + $0x188] sm:$0xff]  ;;  %v3617_v27 = vpack.c.bf16 %v401_v18, %v397_v16  ;;  %v410_v31 = vld [vmem:[%s4605_s3 + $0x1b8] sm:$0xff]  ;;  %v403_v32 = vld [vmem:[%s4605_s3 + $0x180] sm:$0xff]  ;;  %v39_v0 = vsub.s32 0, %v38_v63  ;;  %v43_v5 = vsub.s32 1, %v38_v63 }
  0x15   :  { %183 = vmatprep.mubr.f32.mxu0 %v3322_v2  ;;  %296 = vmatprep.mubr.f32.mxu1 %v3322_v2  ;;  %v408_v23 = vld [vmem:[%s4605_s3 + $0x1a8] sm:$0xff]  ;;  %v407_v33 = vld [vmem:[%s4605_s3 + $0x1a0] sm:$0xff]  ;;  %v405_v34 = vld [vmem:[%s4605_s3 + $0x190] sm:$0xff]  ;;  %v3648_v38 = vpack.c.bf16 %v410_v31, %v406_v28 }
  0x16   :  { %2530 = vmatmul.mubr.msk.f32.gmra.mrb[8].mxu0 %vm61_vm1, %v29_v1  ;;  %2540 = vmatmul.mubr.msk.f32.gmra.mrb[8].mxu1 %vm61_vm1, %v29_v1  ;;  %v409_v35 = vld [vmem:[%s4605_s3 + $0x1b0] sm:$0xff]  ;;  %v3646_v37 = vpack.c.bf16 %v408_v23, %v404_v22  ;;  %v412_v39 = vld [vmem:[%s4605_s3 + $0x1c8] sm:$0xff]  ;;  %v3658_v43 = vpack.c.bf16 %v407_v33, %v403_v32  ;;  %v414_v47 = vld [vmem:[%s4605_s3 + $0x1d8] sm:$0xff]  ;;  %v47_v23 = vsub.s32 2, %v38_v63 }
  0x17   :  { %2616 = vmatprep.subr.bf16.mxu0 %v3560_v3  ;;  %2648 = vmatprep.subr.bf16.mxu1 %v3562_v4  ;;  %v31_v36 = vld [vmem:[%s4604_s0 + $0x30] sm:$0xff]  ;;  %v416_v42 = vld [vmem:[%s4605_s3 + $0x1e8] sm:$0xff]  ;;  %v3660_v46 = vpack.c.bf16 %v409_v35, %v405_v34  ;;  %v418_v48 = vld [vmem:[%s4605_s3 + $0x1f8] sm:$0xff] }
  0x18   :  { %2618 = vmatpush1.bf16.msra.mxu0 %v3572_v7  ;;  %2650 = vmatpush1.bf16.msra.mxu1 %v3574_v8  ;;  %v411_v49 = vld [vmem:[%s4605_s3 + $0x1c0] sm:$0xff]  ;;  %v413_v51 = vld [vmem:[%s4605_s3 + $0x1d0] sm:$0xff]  ;;  %v32_v55 = vld [vmem:[%s4604_s0 + $0x38] sm:$0xff]  ;;  %v3689_v56 = vpack.c.bf16 %v416_v42, %v412_v39  ;;  %v3691_v59 = vpack.c.bf16 %v418_v48, %v414_v47  ;;  %v51_v48 = vsub.s32 3, %v38_v63 }
  0x19   :  { %189 = vmatprep.mubr.f32.mxu0 %v3322_v2  ;;  %302 = vmatprep.mubr.f32.mxu1 %v3322_v2  ;;  %v415_v50 = vld [vmem:[%s4605_s3 + $0x1e0] sm:$0xff]  ;;  %v417_v52 = vld [vmem:[%s4605_s3 + $0x1f0] sm:$0xff] }
  0x1a   :  { %2531 = vmatmul.mubr.msk.f32.gmra.mrb[10].mxu0 %vm61_vm1, %v30_v19  ;;  %2541 = vmatmul.mubr.msk.f32.gmra.mrb[10].mxu1 %vm61_vm1, %v30_v19  ;;  %v3695_v60 = vpack.c.bf16 %v415_v50, %v411_v49  ;;  %v3697_v61 = vpack.c.bf16 %v417_v52, %v413_v51  ;;  %v35_v1 = vld [vmem:[%s4606_s2] sm:$0xf] }
  0x1b   :  { %2620 = vmatprep.subr.bf16.mxu0 %v3603_v20  ;;  %2652 = vmatprep.subr.bf16.mxu1 %v3605_v21  ;;  %v3750_v6 = vrot.slane %v35_v1, %v39_v0  ;;  %v3752_v10 = vrot.slane %v35_v1, %v43_v5  ;;  %v3756_v33 = vrot.slane %v35_v1, %v47_v23 }
  0x1c   :  { %2622 = vmatpush1.bf16.msra.mxu0 %v3615_v24  ;;  %2654 = vmatpush1.bf16.msra.mxu1 %v3617_v27 }
  0x1d   :  { %195 = vmatprep.mubr.f32.mxu0 %v3322_v2  ;;  %308 = vmatprep.mubr.f32.mxu1 %v3322_v2 }
  0x1e   :  { %2532 = vmatmul.mubr.msk.f32.gmra.mrb[12].mxu0 %vm61_vm1, %v31_v36  ;;  %2542 = vmatmul.mubr.msk.f32.gmra.mrb[12].mxu1 %vm61_vm1, %v31_v36 }
  0x1f   :  { %2624 = vmatprep.subr.bf16.mxu0 %v3646_v37  ;;  %2656 = vmatprep.subr.bf16.mxu1 %v3648_v38 }
  0x20   :  { %2626 = vmatpush1.bf16.msra.mxu0 %v3658_v43  ;;  %2658 = vmatpush1.bf16.msra.mxu1 %v3660_v46 }
  0x21   :  { %201 = vmatprep.mubr.f32.mxu0 %v3322_v2  ;;  %314 = vmatprep.mubr.f32.mxu1 %v3322_v2 }
  0x22   :  { %2533 = vmatmul.mubr.msk.f32.gmra.mrb[14].mxu0 %vm61_vm1, %v32_v55  ;;  %2543 = vmatmul.mubr.msk.f32.gmra.mrb[14].mxu1 %vm61_vm1, %v32_v55  ;;  %v3759_v55 = vrot.slane %v35_v1, %v51_v48 }
  0x23   :  { %2628 = vmatprep.subr.bf16.mxu0 %v3689_v56  ;;  %2660 = vmatprep.subr.bf16.mxu1 %v3691_v59 }
  0x24   :  { %2630 = vmatpush1.bf16.msra.mxu0 %v3695_v60  ;;  %2662 = vmatpush1.bf16.msra.mxu1 %v3697_v61 }
  0x25   :  { %487 = vmatprep.mubr.f32.mxu0 %v3322_v2  ;;  %558 = vmatprep.mubr.f32.mxu1 %v3322_v2 }
  0x26   :  { %2664 = vmatprep.subr.bf16.mxu0 %v3373_v9  ;;  %2696 = vmatprep.subr.bf16.mxu1 %v3386_v13 }
  0x27   :  { %488 = vmatmul.mubr.f32.vlgmr.msra.gmra.mrb[0].mxu0 %v3322_v2  ;;  %559 = vmatmul.mubr.f32.vlgmr.msra.gmra.mrb[0].mxu1 %v3322_v2 }
  0x28   :  { %2666 = vmatpush1.bf16.msra.mxu0 %v3388_v14  ;;  %2698 = vmatpush1.bf16.msra.mxu1 %v3398_v17 }
  0x29   :  { %2668 = vmatprep.subr.bf16.mxu0 %v3425_v25  ;;  %2700 = vmatprep.subr.bf16.mxu1 %v3427_v26 }
  0x2a   :  { %756 = vmatprep.mubr.f32.mxu0 %v3322_v2  ;;  %827 = vmatprep.mubr.f32.mxu1 %v3322_v2 }
  0x2c   :  { %2670 = vmatpush1.bf16.msra.mxu0 %v3437_v29  ;;  %2702 = vmatpush1.bf16.msra.mxu1 %v3439_v30 }
  0x2d   :  { %2672 = vmatprep.subr.bf16.mxu0 %v3474_v40  ;;  %2704 = vmatprep.subr.bf16.mxu1 %v3476_v41 }
  0x30   :  { %2674 = vmatpush1.bf16.msra.mxu0 %v3486_v44  ;;  %2706 = vmatpush1.bf16.msra.mxu1 %v3488_v45 }
  0x31   :  { %2676 = vmatprep.subr.bf16.mxu0 %v3517_v53  ;;  %2708 = vmatprep.subr.bf16.mxu1 %v3519_v54 }
  0x34   :  { %2678 = vmatpush1.bf16.msra.mxu0 %v3529_v57  ;;  %2710 = vmatpush1.bf16.msra.mxu1 %v3531_v58 }
  0x35   :  { %2680 = vmatprep.subr.bf16.mxu0 %v3560_v3  ;;  %2712 = vmatprep.subr.bf16.mxu1 %v3562_v4 }
  0x38   :  { %2682 = vmatpush1.bf16.msra.mxu0 %v3572_v7  ;;  %2714 = vmatpush1.bf16.msra.mxu1 %v3574_v8 }
  0x39   :  { %2684 = vmatprep.subr.bf16.mxu0 %v3603_v20  ;;  %2716 = vmatprep.subr.bf16.mxu1 %v3605_v21 }
  0x3c   :  { %2686 = vmatpush1.bf16.msra.mxu0 %v3615_v24  ;;  %2718 = vmatpush1.bf16.msra.mxu1 %v3617_v27 }
  0x3d   :  { %2688 = vmatprep.subr.bf16.mxu0 %v3646_v37  ;;  %2720 = vmatprep.subr.bf16.mxu1 %v3648_v38 }
  0x40   :  { %2690 = vmatpush1.bf16.msra.mxu0 %v3658_v43  ;;  %2722 = vmatpush1.bf16.msra.mxu1 %v3660_v46 }
  0x41   :  { %2692 = vmatprep.subr.bf16.mxu0 %v3689_v56  ;;  %2724 = vmatprep.subr.bf16.mxu1 %v3691_v59 }
  0x44   :  { %2694 = vmatpush1.bf16.msra.mxu0 %v3695_v60  ;;  %2726 = vmatpush1.bf16.msra.mxu1 %v3697_v61 }
  0x45   :  { %2728 = vmatprep.subr.bf16.mxu0 %v3373_v9  ;;  %2760 = vmatprep.subr.bf16.mxu1 %v3386_v13 }
  0xfa   :  { %v489_v11 = vpop.f32.mrb[0].mxu0  ;;  %v560_v12 = vpop.f32.mrb[0].mxu1 }
  0xfb   :  { %v3111_v15 = vadd.f32 %v489_v11, %v3750_v6  ;;  %v491_v16 = vpop.f32.mrb[1].mxu0  ;;  %v562_v9 = vpop.f32.mrb[1].mxu1  ;;  %v3127_v34 = vadd.f32 %v560_v12, %v3756_v33 }
  0xfc   :  { %v3112_v13 = vadd.f32 %v491_v16, %v3752_v10 }
  0xfd   :  { %v2544_v18 = vmul.f32 -1.442695, %v3111_v15  ;;  %v2546_v35 = vmul.f32 -1.442695, %v3127_v34  ;;  %v3128_v15 = vadd.f32 %v562_v9, %v3759_v55 }
  0xfe   :  { %v2545_v19 = vmul.f32 -1.442695, %v3112_v13 }
  0xff   :  { %3178 = vpow2.f32 %v2544_v18 }
 0x100   :  { %3180 = vpow2.f32 %v2545_v19  ;;  %v2547_v19 = vmul.f32 -1.442695, %v3128_v15 }
 0x109   :  { %v3179_v22 = vpop.eup %3178 }
 0x10a   :  { %v577_v28 = vadd.f32 1.0, %v3179_v22  ;;  %v3181_v31 = vpop.eup %3180 }
 0x10b   :  { %v578_v32 = vadd.f32 1.0, %v3181_v31 }
 0x10c   :  { %3182 = vrcp.f32 %v577_v28 }
 0x10d   :  { %3184 = vrcp.f32 %v578_v32 }
 0x10e   :  { %3186 = vpow2.f32 %v2546_v35 }
 0x10f   :  { %3188 = vpow2.f32 %v2547_v19 }
 0x116   :  { %v3183_v36 = vpop.eup %3182 }
 0x117   :  { %v589_v39 = vmul.f32 2.0, %v3183_v36  ;;  %v3185_v42 = vpop.eup %3184 }
 0x118   :  { %v593_v49 = vmul.f32 -0.00015625, %v3185_v42  ;;  %v3187_v16 = vpop.eup %3186 }
 0x119   :  { %v2548_v47 = vadd.f32 -1.0, %v589_v39  ;;  %v579_v23 = vadd.f32 1.0, %v3187_v16  ;;  %v3189_v48 = vpop.eup %3188 }
 0x11a   :  { %v594_v51 = vadd.f32 1.0, %v593_v49 }
 0x11b   :  { %v591_v50 = vmul.f32 -7.8125e-05, %v2548_v47  ;;  %3190 = vrcp.f32 %v579_v23 }
 0x11c   :  { %v596_v62 = vsub.f32 1.0, %v594_v51  ;;  %v595_v0 = vmul.f32 0.1, %v594_v51 }
 0x11d   :  { %v592_v52 = vadd.f32 1.0, %v591_v50 }
 0x11e   :  { %v597_v5 = vmul.f32 %v3185_v42, %v596_v62  ;;  %v580_v62 = vadd.f32 1.0, %v3189_v48 }
 0x11f   :  { %v602_v11 = vsub.f32 1.0, %v592_v52  ;;  %v601_v63 = vmul.f32 %v2548_v47, %v592_v52 }
 0x120   :  { %v598_v12 = vadd.f32 %v597_v5, %v595_v0  ;;  %3192 = vrcp.f32 %v580_v62 }
 0x121   :  { %v603_v18 = vmul.f32 0.0, %v602_v11 }
 0x122   :  { %v599_v13 = vmul.f32 1.8, %v598_v12 }
 0x123   :  { %v604_v31 = vadd.f32 %v603_v18, %v601_v63 }
 0x124   :  { %v600_v22 = vadd.f32 0.04, %v599_v13 }
 0x125   :  { %v3191_v50 = vpop.eup %3190 }
 0x126   :  { %v605_v28 = vmul.f32 %v3185_v42, %v600_v22  ;;  %v616_v0 = vmul.f32 0.0, %v3191_v50 }
 0x128   :  { %v606_v32 = vmul.f32 0.01, %v605_v28 }
 0x12a   :  { %v607_v1 = vsub.f32 %v604_v31, %v606_v32  ;;  %v3193_v5 = vpop.eup %3192 }
 0x12c   :  { %v608_v34 = vsub.f32 %v607_v1, %v600_v22  ;;  %v612_v36 = vmul.f32 0.99004984, %v607_v1 }
 0x12e   :  { %vm609_vm2 = vcmp.gt.f32.partialorder %v608_v34, 0.0 }
 0x12f   :  { %v2549_v35 = vsel %vm609_vm2, 1.0, %v3322_v2 }
 0x130   :  { %v613_v9 = vmul.f32 0.009950167, %v2549_v35  ;;  %v617_v39 = vmul.f32 %v3185_v42, %v2549_v35 }
 0x132   :  { %v614_v49 = vadd.f32 %v613_v9, %v612_v36 }
 0x134   :  { %v615_v51 = vadd.f32 0.08, %v614_v49 }
 0x136   :  { %v618_v47 = vmul.f32 %v617_v39, %v615_v51 }
 0x138   :  { %v3763_v52 = vadd.f32 %v618_v47, %v616_v0 }
 0x13a   :  { %3194 = vtanh.f32 %v3763_v52 }
 0x144   :  { %v3195_v11 = vpop.eup %3194 }
 0x145   :  { %v3766_v15 = vmul.f32 %v3195_v11, %v3193_v5  ;;  %v1168_v5 = vld [vmem:[%s4605_s3 + $0x28] sm:$0xff]  ;;  %v1166_v11 = vld [vmem:[%s4605_s3 + $0x18] sm:$0xff] }
 0x147   :  { %622 = vst [vmem:[%s4607_s4] sm:$0xff] %v3766_v15  ;;  %757 = vmatmul.mubr.f32.vlgmr.msra.gmra.mrb[2].mxu0 %v3766_v15  ;;  %828 = vmatmul.mubr.f32.vlgmr.msra.gmra.mrb[2].mxu1 %v3766_v15 }
 0x148   :  { %2730 = vmatpush1.bf16.msra.mxu0 %v3388_v14  ;;  %2762 = vmatpush1.bf16.msra.mxu1 %v3398_v17 }
 0x149   :  { %2732 = vmatprep.subr.bf16.mxu0 %v3425_v25  ;;  %2764 = vmatprep.subr.bf16.mxu1 %v3427_v26 }
 0x14a   :  { %1026 = vmatprep.mubr.f32.mxu0 %v3322_v2  ;;  %1097 = vmatprep.mubr.f32.mxu1 %v3322_v2 }
 0x14c   :  { %2734 = vmatpush1.bf16.msra.mxu0 %v3437_v29  ;;  %2766 = vmatpush1.bf16.msra.mxu1 %v3439_v30 }
 0x14d   :  { %2736 = vmatprep.subr.bf16.mxu0 %v3474_v40  ;;  %2768 = vmatprep.subr.bf16.mxu1 %v3476_v41 }
 0x150   :  { %2738 = vmatpush1.bf16.msra.mxu0 %v3486_v44  ;;  %2770 = vmatpush1.bf16.msra.mxu1 %v3488_v45 }
 0x151   :  { %2740 = vmatprep.subr.bf16.mxu0 %v3517_v53  ;;  %2772 = vmatprep.subr.bf16.mxu1 %v3519_v54 }
 0x154   :  { %2742 = vmatpush1.bf16.msra.mxu0 %v3529_v57  ;;  %2774 = vmatpush1.bf16.msra.mxu1 %v3531_v58 }
 0x155   :  { %2744 = vmatprep.subr.bf16.mxu0 %v3560_v3  ;;  %2776 = vmatprep.subr.bf16.mxu1 %v3562_v4 }
 0x158   :  { %2746 = vmatpush1.bf16.msra.mxu0 %v3572_v7  ;;  %2778 = vmatpush1.bf16.msra.mxu1 %v3574_v8 }
 0x159   :  { %2748 = vmatprep.subr.bf16.mxu0 %v3603_v20  ;;  %2780 = vmatprep.subr.bf16.mxu1 %v3605_v21 }
 0x15c   :  { %2750 = vmatpush1.bf16.msra.mxu0 %v3615_v24  ;;  %2782 = vmatpush1.bf16.msra.mxu1 %v3617_v27 }
 0x15d   :  { %2752 = vmatprep.subr.bf16.mxu0 %v3646_v37  ;;  %2784 = vmatprep.subr.bf16.mxu1 %v3648_v38 }
 0x160   :  { %2754 = vmatpush1.bf16.msra.mxu0 %v3658_v43  ;;  %2786 = vmatpush1.bf16.msra.mxu1 %v3660_v46 }
 0x161   :  { %2756 = vmatprep.subr.bf16.mxu0 %v3689_v56  ;;  %2788 = vmatprep.subr.bf16.mxu1 %v3691_v59 }
 0x164   :  { %2758 = vmatpush1.bf16.msra.mxu0 %v3695_v60  ;;  %2790 = vmatpush1.bf16.msra.mxu1 %v3697_v61 }
 0x21a   :  { %v758_v14 = vpop.f32.mrb[2].mxu0  ;;  %v829_v17 = vpop.f32.mrb[2].mxu1 }
 0x21b   :  { %v3113_v25 = vadd.f32 %v758_v14, %v3750_v6  ;;  %v760_v26 = vpop.f32.mrb[3].mxu0  ;;  %v831_v29 = vpop.f32.mrb[3].mxu1  ;;  %v3129_v57 = vadd.f32 %v829_v17, %v3756_v33  ;;  %v1170_v14 = vld [vmem:[%s4605_s3 + $0x38] sm:$0xff]  ;;  %v1163_v17 = vld [vmem:[%s4605_s3] sm:$0xff] }
 0x21c   :  { %v3114_v30 = vadd.f32 %v760_v26, %v3752_v10  ;;  %v3130_v56 = vadd.f32 %v831_v29, %v3759_v55  ;;  %v3846_v26 = vpack.c.bf16 %v1170_v14, %v1166_v11  ;;  %v1208_v11 = vld [vmem:[%s4605_s3 + $0x168] sm:$0xff]  ;;  %v1206_v14 = vld [vmem:[%s4605_s3 + $0x158] sm:$0xff] }
 0x21d   :  { %v2550_v40 = vmul.f32 -1.442695, %v3113_v25  ;;  %v2552_v58 = vmul.f32 -1.442695, %v3129_v57  ;;  %v1167_v25 = vld [vmem:[%s4605_s3 + $0x20] sm:$0xff] }
 0x21e   :  { %v2551_v41 = vmul.f32 -1.442695, %v3114_v30  ;;  %v2553_v12 = vmul.f32 -1.442695, %v3130_v56  ;;  %v3848_v29 = vpack.c.bf16 %v1167_v25, %v1163_v17  ;;  %v1165_v30 = vld [vmem:[%s4605_s3 + $0x10] sm:$0xff]  ;;  %2824 = vmatprep.subr.bf16.mxu1 %v3846_v26  ;;  %v1210_v17 = vld [vmem:[%s4605_s3 + $0x178] sm:$0xff] }
 0x21f   :  { %3196 = vpow2.f32 %v2550_v40  ;;  %v1169_v40 = vld [vmem:[%s4605_s3 + $0x30] sm:$0xff] }
 0x220   :  { %3198 = vpow2.f32 %v2551_v41  ;;  %v1172_v41 = vld [vmem:[%s4605_s3 + $0x48] sm:$0xff] }
 0x229   :  { %v3197_v44 = vpop.eup %3196 }
 0x22a   :  { %v846_v45 = vadd.f32 1.0, %v3197_v44  ;;  %v3199_v53 = vpop.eup %3198  ;;  %v3860_v44 = vpack.c.bf16 %v1169_v40, %v1165_v30 }
 0x22b   :  { %v847_v54 = vadd.f32 1.0, %v3199_v53  ;;  %v1174_v53 = vld [vmem:[%s4605_s3 + $0x58] sm:$0xff] }
 0x22c   :  { %3200 = vrcp.f32 %v846_v45  ;;  %v1176_v45 = vld [vmem:[%s4605_s3 + $0x68] sm:$0xff] }
 0x22d   :  { %3202 = vrcp.f32 %v847_v54  ;;  %v1178_v54 = vld [vmem:[%s4605_s3 + $0x78] sm:$0xff]  ;;  %v3873_v57 = vpack.c.bf16 %v1176_v45, %v1172_v41  ;;  %v1203_v41 = vld [vmem:[%s4605_s3 + $0x140] sm:$0xff] }
 0x22e   :  { %3204 = vpow2.f32 %v2552_v58  ;;  %v3875_v58 = vpack.c.bf16 %v1178_v54, %v1174_v53  ;;  %v1207_v45 = vld [vmem:[%s4605_s3 + $0x160] sm:$0xff]  ;;  %v1205_v53 = vld [vmem:[%s4605_s3 + $0x150] sm:$0xff]  ;;  %v4027_v54 = vpack.c.bf16 %v1210_v17, %v1206_v14 }
 0x22f   :  { %3206 = vpow2.f32 %v2553_v12  ;;  %v1188_v12 = vld [vmem:[%s4605_s3 + $0xc8] sm:$0xff] }
 0x236   :  { %v3201_v3 = vpop.eup %3200 }
 0x237   :  { %v858_v4 = vmul.f32 2.0, %v3201_v3  ;;  %v3203_v7 = vpop.eup %3202  ;;  %v1171_v3 = vld [vmem:[%s4605_s3 + $0x40] sm:$0xff] }
 0x238   :  { %v862_v20 = vmul.f32 -0.00015625, %v3203_v7  ;;  %v3205_v60 = vpop.eup %3204 }
 0x239   :  { %v2554_v8 = vadd.f32 -1.0, %v858_v4  ;;  %v848_v13 = vadd.f32 1.0, %v3205_v60  ;;  %v3207_v35 = vpop.eup %3206  ;;  %v1175_v4 = vld [vmem:[%s4605_s3 + $0x60] sm:$0xff]  ;;  %v1181_v60 = vld [vmem:[%s4605_s3 + $0x90] sm:$0xff] }
 0x23a   :  { %v863_v24 = vadd.f32 1.0, %v862_v20  ;;  %v849_v48 = vadd.f32 1.0, %v3207_v35  ;;  %v1177_v20 = vld [vmem:[%s4605_s3 + $0x70] sm:$0xff]  ;;  %v1198_v35 = vld [vmem:[%s4605_s3 + $0x118] sm:$0xff] }
 0x23b   :  { %v860_v21 = vmul.f32 -7.8125e-05, %v2554_v8  ;;  %3208 = vrcp.f32 %v848_v13  ;;  %v1190_v13 = vld [vmem:[%s4605_s3 + $0xd8] sm:$0xff] }
 0x23c   :  { %v865_v37 = vsub.f32 1.0, %v863_v24  ;;  %v864_v38 = vmul.f32 0.1, %v863_v24  ;;  %3210 = vrcp.f32 %v849_v48  ;;  %v1184_v24 = vld [vmem:[%s4605_s3 + $0xa8] sm:$0xff] }
 0x23d   :  { %v861_v27 = vadd.f32 1.0, %v860_v21  ;;  %v1180_v21 = vld [vmem:[%s4605_s3 + $0x88] sm:$0xff] }
 0x23e   :  { %v866_v43 = vmul.f32 %v3203_v7, %v865_v37  ;;  %v3902_v37 = vpack.c.bf16 %v1184_v24, %v1180_v21  ;;  %v1218_v21 = vld [vmem:[%s4605_s3 + $0x1b8] sm:$0xff]  ;;  %v4045_v24 = vpack.c.bf16 %v1207_v45, %v1203_v41 }
 0x23f   :  { %v871_v46 = vsub.f32 1.0, %v861_v27  ;;  %v870_v18 = vmul.f32 %v2554_v8, %v861_v27  ;;  %v3887_v8 = vpack.c.bf16 %v1175_v4, %v1171_v3  ;;  %v1209_v3 = vld [vmem:[%s4605_s3 + $0x170] sm:$0xff]  ;;  %v1212_v4 = vld [vmem:[%s4605_s3 + $0x188] sm:$0xff] }
 0x240   :  { %v867_v59 = vadd.f32 %v866_v43, %v864_v38  ;;  %v1182_v38 = vld [vmem:[%s4605_s3 + $0x98] sm:$0xff] }
 0x241   :  { %v872_v42 = vmul.f32 %v871_v46, %v3766_v15  ;;  %v1186_v43 = vld [vmem:[%s4605_s3 + $0xb8] sm:$0xff]  ;;  %v1179_v46 = vld [vmem:[%s4605_s3 + $0x80] sm:$0xff] }
 0x242   :  { %v868_v61 = vmul.f32 1.8, %v867_v59  ;;  %v3913_v56 = vpack.c.bf16 %v1186_v43, %v1182_v38  ;;  %v1183_v59 = vld [vmem:[%s4605_s3 + $0xa0] sm:$0xff]  ;;  %v4049_v38 = vpack.c.bf16 %v1209_v3, %v1205_v53 }
 0x243   :  { %v873_v22 = vadd.f32 %v872_v42, %v870_v18  ;;  %v3925_v42 = vpack.c.bf16 %v1183_v59, %v1179_v46  ;;  %v1211_v46 = vld [vmem:[%s4605_s3 + $0x180] sm:$0xff] }
 0x244   :  { %v869_v16 = vadd.f32 0.04, %v868_v61  ;;  %v1185_v61 = vld [vmem:[%s4605_s3 + $0xb0] sm:$0xff]  ;;  %v1215_v59 = vld [vmem:[%s4605_s3 + $0x1a0] sm:$0xff] }
 0x245   :  { %v3209_v9 = vpop.eup %3208  ;;  %v3938_v18 = vpack.c.bf16 %v1185_v61, %v1181_v60  ;;  %v1213_v60 = vld [vmem:[%s4605_s3 + $0x190] sm:$0xff] }
 0x246   :  { %v874_v19 = vmul.f32 %v3203_v7, %v869_v16  ;;  %v885_v49 = vmul.f32 %v3209_v9, %v3763_v52  ;;  %v3211_v62 = vpop.eup %3210  ;;  %v1164_v52 = vld [vmem:[%s4605_s3 + $0x8] sm:$0xff] }
 0x247   :  { %v3835_v15 = vpack.c.bf16 %v1168_v5, %v1164_v52  ;;  %v1201_v52 = vld [vmem:[%s4605_s3 + $0x130] sm:$0xff]  ;;  %v1204_v5 = vld [vmem:[%s4605_s3 + $0x148] sm:$0xff] }
 0x248   :  { %v875_v23 = vmul.f32 0.01, %v874_v19  ;;  %v4015_v40 = vpack.c.bf16 %v1208_v11, %v1204_v5 }
 0x249   :  { %2792 = vmatprep.subr.bf16.mxu0 %v3835_v15 }
 0x24a   :  { %v876_v63 = vsub.f32 %v873_v22, %v875_v23  ;;  %v1194_v22 = vld [vmem:[%s4605_s3 + $0xf8] sm:$0xff]  ;;  %v1187_v23 = vld [vmem:[%s4605_s3 + $0xc0] sm:$0xff] }
 0x24c   :  { %v877_v28 = vsub.f32 %v876_v63, %v869_v16  ;;  %v881_v32 = vmul.f32 0.99004984, %v876_v63  ;;  %v1192_v16 = vld [vmem:[%s4605_s3 + $0xe8] sm:$0xff]  ;;  %v1191_v63 = vld [vmem:[%s4605_s3 + $0xe0] sm:$0xff] }
 0x24d   :  { %v3940_v19 = vpack.c.bf16 %v1192_v16, %v1188_v12  ;;  %v3973_v9 = vpack.c.bf16 %v1191_v63, %v1187_v23  ;;  %v1217_v12 = vld [vmem:[%s4605_s3 + $0x1b0] sm:$0xff]  ;;  %v1220_v16 = vld [vmem:[%s4605_s3 + $0x1c8] sm:$0xff]  ;;  %v1226_v23 = vld [vmem:[%s4605_s3 + $0x1f8] sm:$0xff]  ;;  %v4081_v63 = vpack.c.bf16 %v1215_v59, %v1211_v46 }
 0x24e   :  { %vm878_vm3 = vcmp.gt.f32.partialorder %v877_v28, 0.0  ;;  %v3952_v28 = vpack.c.bf16 %v1194_v22, %v1190_v13  ;;  %v1224_v13 = vld [vmem:[%s4605_s3 + $0x1e8] sm:$0xff]  ;;  %v1222_v22 = vld [vmem:[%s4605_s3 + $0x1d8] sm:$0xff] }
 0x24f   :  { %v2555_v31 = vsel %vm878_vm3, 1.0, %v3322_v2 }
 0x250   :  { %v882_v1 = vmul.f32 0.009950167, %v2555_v31  ;;  %v886_v34 = vmul.f32 %v3203_v7, %v2555_v31  ;;  %v1173_v7 = vld [vmem:[%s4605_s3 + $0x50] sm:$0xff] }
 0x251   :  { %v3900_v27 = vpack.c.bf16 %v1177_v20, %v1173_v7  ;;  %v1189_v31 = vld [vmem:[%s4605_s3 + $0xd0] sm:$0xff]  ;;  %v1216_v7 = vld [vmem:[%s4605_s3 + $0x1a8] sm:$0xff]  ;;  %v1214_v20 = vld [vmem:[%s4605_s3 + $0x198] sm:$0xff] }
 0x252   :  { %v883_v36 = vadd.f32 %v882_v1, %v881_v32  ;;  %v1193_v32 = vld [vmem:[%s4605_s3 + $0xf0] sm:$0xff]  ;;  %v1196_v1 = vld [vmem:[%s4605_s3 + $0x108] sm:$0xff]  ;;  %v4051_v43 = vpack.c.bf16 %v1216_v7, %v1212_v4  ;;  %v4063_v61 = vpack.c.bf16 %v1218_v21, %v1214_v20 }
 0x254   :  { %v884_v39 = vadd.f32 0.08, %v883_v36  ;;  %v1202_v36 = vld [vmem:[%s4605_s3 + $0x138] sm:$0xff] }
 0x256   :  { %v887_v50 = vmul.f32 %v886_v34, %v884_v39  ;;  %v1200_v34 = vld [vmem:[%s4605_s3 + $0x128] sm:$0xff]  ;;  %v3977_v39 = vpack.c.bf16 %v1193_v32, %v1189_v31  ;;  %v4085_v31 = vpack.c.bf16 %v1217_v12, %v1213_v60  ;;  %v4087_v32 = vpack.c.bf16 %v1224_v13, %v1220_v16 }
 0x257   :  { %v3979_v48 = vpack.c.bf16 %v1200_v34, %v1196_v1  ;;  %v1219_v1 = vld [vmem:[%s4605_s3 + $0x1c0] sm:$0xff] }
 0x258   :  { %v3813_v51 = vadd.f32 %v887_v50, %v885_v49  ;;  %v1195_v49 = vld [vmem:[%s4605_s3 + $0x100] sm:$0xff] }
 0x259   :  { %v1199_v50 = vld [vmem:[%s4605_s3 + $0x120] sm:$0xff] }
 0x25a   :  { %3212 = vtanh.f32 %v3813_v51  ;;  %v4009_v25 = vpack.c.bf16 %v1199_v50, %v1195_v49  ;;  %v1223_v34 = vld [vmem:[%s4605_s3 + $0x1e0] sm:$0xff]  ;;  %v1225_v49 = vld [vmem:[%s4605_s3 + $0x1f0] sm:$0xff] }
 0x25b   :  { %v4105_v50 = vpack.c.bf16 %v1223_v34, %v1219_v1 }
 0x264   :  { %v3213_v0 = vpop.eup %3212 }
 0x265   :  { %v3816_v47 = vmul.f32 %v3213_v0, %v3211_v62  ;;  %v1197_v62 = vld [vmem:[%s4605_s3 + $0x110] sm:$0xff]  ;;  %v3991_v0 = vpack.c.bf16 %v1202_v36, %v1198_v35  ;;  %v4096_v35 = vpack.c.bf16 %v1226_v23, %v1222_v22 }
 0x266   :  { %v4013_v30 = vpack.c.bf16 %v1201_v52, %v1197_v62  ;;  %v1221_v36 = vld [vmem:[%s4605_s3 + $0x1d0] sm:$0xff] }
 0x267   :  { %2556 = vst [vmem:[%s4607_s4 + $0x8] sm:$0xff] %v3816_v47  ;;  %1027 = vmatmul.mubr.f32.vlgmr.msra.gmra.mrb[4].mxu0 %v3816_v47  ;;  %1098 = vmatmul.mubr.f32.vlgmr.msra.gmra.mrb[4].mxu1 %v3816_v47  ;;  %v4109_v62 = vpack.c.bf16 %v1225_v49, %v1221_v36 }
 0x268   :  { %1296 = vmatprep.mubr.f32.mxu0 %v3322_v2  ;;  %1367 = vmatprep.mubr.f32.mxu1 %v3322_v2 }
 0x269   :  { %2794 = vmatpush1.bf16.msra.mxu0 %v3848_v29  ;;  %2826 = vmatpush1.bf16.msra.mxu1 %v3860_v44 }
 0x26a   :  { %2796 = vmatprep.subr.bf16.mxu0 %v3873_v57  ;;  %2828 = vmatprep.subr.bf16.mxu1 %v3875_v58 }
 0x26d   :  { %2798 = vmatpush1.bf16.msra.mxu0 %v3887_v8  ;;  %2830 = vmatpush1.bf16.msra.mxu1 %v3900_v27 }
 0x26e   :  { %2800 = vmatprep.subr.bf16.mxu0 %v3902_v37  ;;  %2832 = vmatprep.subr.bf16.mxu1 %v3913_v56 }
 0x271   :  { %2802 = vmatpush1.bf16.msra.mxu0 %v3925_v42  ;;  %2834 = vmatpush1.bf16.msra.mxu1 %v3938_v18 }
 0x272   :  { %2804 = vmatprep.subr.bf16.mxu0 %v3940_v19  ;;  %2836 = vmatprep.subr.bf16.mxu1 %v3952_v28 }
 0x275   :  { %2806 = vmatpush1.bf16.msra.mxu0 %v3973_v9  ;;  %2838 = vmatpush1.bf16.msra.mxu1 %v3977_v39 }
 0x276   :  { %2808 = vmatprep.subr.bf16.mxu0 %v3979_v48  ;;  %2840 = vmatprep.subr.bf16.mxu1 %v3991_v0 }
 0x279   :  { %2810 = vmatpush1.bf16.msra.mxu0 %v4009_v25  ;;  %2842 = vmatpush1.bf16.msra.mxu1 %v4013_v30 }
 0x27a   :  { %2812 = vmatprep.subr.bf16.mxu0 %v4015_v40  ;;  %2844 = vmatprep.subr.bf16.mxu1 %v4027_v54 }
 0x27d   :  { %2814 = vmatpush1.bf16.msra.mxu0 %v4045_v24  ;;  %2846 = vmatpush1.bf16.msra.mxu1 %v4049_v38 }
 0x27e   :  { %2816 = vmatprep.subr.bf16.mxu0 %v4051_v43  ;;  %2848 = vmatprep.subr.bf16.mxu1 %v4063_v61 }
 0x281   :  { %2818 = vmatpush1.bf16.msra.mxu0 %v4081_v63  ;;  %2850 = vmatpush1.bf16.msra.mxu1 %v4085_v31 }
 0x282   :  { %2820 = vmatprep.subr.bf16.mxu0 %v4087_v32  ;;  %2852 = vmatprep.subr.bf16.mxu1 %v4096_v35 }
 0x285   :  { %2822 = vmatpush1.bf16.msra.mxu0 %v4105_v50  ;;  %2854 = vmatpush1.bf16.msra.mxu1 %v4109_v62 }
 0x286   :  { %2856 = vmatprep.subr.bf16.mxu0 %v3835_v15  ;;  %2888 = vmatprep.subr.bf16.mxu1 %v3846_v26 }
 0x33a   :  { %v1028_v52 = vpop.f32.mrb[4].mxu0  ;;  %v1099_v5 = vpop.f32.mrb[4].mxu1 }
 0x33b   :  { %v3115_v11 = vadd.f32 %v1028_v52, %v3750_v6  ;;  %v1030_v14 = vpop.f32.mrb[5].mxu0  ;;  %v1101_v17 = vpop.f32.mrb[5].mxu1  ;;  %v3131_v21 = vadd.f32 %v1099_v5, %v3756_v33 }
 0x33c   :  { %v3116_v41 = vadd.f32 %v1030_v14, %v3752_v10 }
 0x33d   :  { %v2557_v45 = vmul.f32 -1.442695, %v3115_v11  ;;  %v2559_v46 = vmul.f32 -1.442695, %v3131_v21  ;;  %v3132_v11 = vadd.f32 %v1101_v17, %v3759_v55 }
 0x33e   :  { %v2558_v53 = vmul.f32 -1.442695, %v3116_v41 }
 0x33f   :  { %3214 = vpow2.f32 %v2557_v45 }
 0x340   :  { %3216 = vpow2.f32 %v2558_v53  ;;  %v2560_v53 = vmul.f32 -1.442695, %v3132_v11 }
 0x349   :  { %v3215_v3 = vpop.eup %3214 }
 0x34a   :  { %v1116_v4 = vadd.f32 1.0, %v3215_v3  ;;  %v3217_v7 = vpop.eup %3216 }
 0x34b   :  { %v1117_v20 = vadd.f32 1.0, %v3217_v7 }
 0x34c   :  { %3218 = vrcp.f32 %v1116_v4 }
 0x34d   :  { %3220 = vrcp.f32 %v1117_v20 }
 0x34e   :  { %3222 = vpow2.f32 %v2559_v46 }
 0x34f   :  { %3224 = vpow2.f32 %v2560_v53 }
 0x356   :  { %v3219_v59 = vpop.eup %3218 }
 0x357   :  { %v1128_v60 = vmul.f32 2.0, %v3219_v59  ;;  %v3221_v12 = vpop.eup %3220 }
 0x358   :  { %v1132_v13 = vmul.f32 -0.00015625, %v3221_v12  ;;  %v3223_v41 = vpop.eup %3222 }
 0x359   :  { %v2561_v16 = vadd.f32 -1.0, %v1128_v60  ;;  %v1118_v4 = vadd.f32 1.0, %v3223_v41 }
 0x35a   :  { %v1133_v23 = vadd.f32 1.0, %v1132_v13 }
 0x35b   :  { %v1130_v22 = vmul.f32 -7.8125e-05, %v2561_v16  ;;  %3226 = vrcp.f32 %v1118_v4 }
 0x35c   :  { %v1135_v34 = vsub.f32 1.0, %v1133_v23  ;;  %v1134_v36 = vmul.f32 0.1, %v1133_v23 }
 0x35d   :  { %v1131_v1 = vadd.f32 1.0, %v1130_v22 }
 0x35e   :  { %v1136_v49 = vmul.f32 %v3221_v12, %v1135_v34  ;;  %v3225_v34 = vpop.eup %3224 }
 0x35f   :  { %v1141_v52 = vsub.f32 1.0, %v1131_v1  ;;  %v1140_v7 = vmul.f32 %v2561_v16, %v1131_v1 }
 0x360   :  { %v1137_v14 = vadd.f32 %v1136_v49, %v1134_v36 }
 0x361   :  { %v1142_v5 = vmul.f32 %v1141_v52, %v3816_v47  ;;  %v1119_v52 = vadd.f32 1.0, %v3225_v34 }
 0x362   :  { %v1138_v45 = vmul.f32 1.8, %v1137_v14 }
 0x363   :  { %v1143_v21 = vadd.f32 %v1142_v5, %v1140_v7  ;;  %3228 = vrcp.f32 %v1119_v52 }
 0x364   :  { %v1139_v3 = vadd.f32 0.04, %v1138_v45 }
 0x365   :  { %v3227_v47 = vpop.eup %3226 }
 0x366   :  { %v1144_v20 = vmul.f32 %v3221_v12, %v1139_v3  ;;  %v1155_v16 = vmul.f32 %v3227_v47, %v3813_v51 }
 0x368   :  { %v1145_v46 = vmul.f32 0.01, %v1144_v20 }
 0x36a   :  { %v1146_v59 = vsub.f32 %v1143_v21, %v1145_v46 }
 0x36c   :  { %v1147_v60 = vsub.f32 %v1146_v59, %v1139_v3  ;;  %v1151_v17 = vmul.f32 0.99004984, %v1146_v59 }
 0x36d   :  { %v3229_v14 = vpop.eup %3228 }
 0x36e   :  { %vm1148_vm4 = vcmp.gt.f32.partialorder %v1147_v60, 0.0 }
 0x36f   :  { %v2562_v13 = vsel %vm1148_vm4, 1.0, %v3322_v2 }
 0x370   :  { %v1152_v22 = vmul.f32 0.009950167, %v2562_v13  ;;  %v1156_v23 = vmul.f32 %v3221_v12, %v2562_v13 }
 0x372   :  { %v1153_v36 = vadd.f32 %v1152_v22, %v1151_v17 }
 0x374   :  { %v1154_v49 = vadd.f32 0.08, %v1153_v36 }
 0x376   :  { %v1157_v1 = vmul.f32 %v1156_v23, %v1154_v49 }
 0x378   :  { %v4123_v11 = vadd.f32 %v1157_v1, %v1155_v16 }
 0x37a   :  { %3230 = vtanh.f32 %v4123_v11 }
 0x384   :  { %v3231_v41 = vpop.eup %3230 }
 0x385   :  { %v4126_v45 = vmul.f32 %v3231_v41, %v3229_v14 }
 0x387   :  { %2563 = vst [vmem:[%s4607_s4 + $0x10] sm:$0xff] %v4126_v45  ;;  %1297 = vmatmul.mubr.f32.vlgmr.msra.gmra.mrb[6].mxu0 %v4126_v45  ;;  %1368 = vmatmul.mubr.f32.vlgmr.msra.gmra.mrb[6].mxu1 %v4126_v45 }
 0x388   :  { %2858 = vmatpush1.bf16.msra.mxu0 %v3848_v29  ;;  %2890 = vmatpush1.bf16.msra.mxu1 %v3860_v44 }
 0x389   :  { %2860 = vmatprep.subr.bf16.mxu0 %v3873_v57  ;;  %2892 = vmatprep.subr.bf16.mxu1 %v3875_v58 }
 0x38a   :  { %1566 = vmatprep.mubr.f32.mxu0 %v3322_v2  ;;  %1637 = vmatprep.mubr.f32.mxu1 %v3322_v2 }
 0x38c   :  { %2862 = vmatpush1.bf16.msra.mxu0 %v3887_v8  ;;  %2894 = vmatpush1.bf16.msra.mxu1 %v3900_v27 }
 0x38d   :  { %2864 = vmatprep.subr.bf16.mxu0 %v3902_v37  ;;  %2896 = vmatprep.subr.bf16.mxu1 %v3913_v56 }
 0x390   :  { %2866 = vmatpush1.bf16.msra.mxu0 %v3925_v42  ;;  %2898 = vmatpush1.bf16.msra.mxu1 %v3938_v18 }
 0x391   :  { %2868 = vmatprep.subr.bf16.mxu0 %v3940_v19  ;;  %2900 = vmatprep.subr.bf16.mxu1 %v3952_v28 }
 0x394   :  { %2870 = vmatpush1.bf16.msra.mxu0 %v3973_v9  ;;  %2902 = vmatpush1.bf16.msra.mxu1 %v3977_v39 }
 0x395   :  { %2872 = vmatprep.subr.bf16.mxu0 %v3979_v48  ;;  %2904 = vmatprep.subr.bf16.mxu1 %v3991_v0 }
 0x398   :  { %2874 = vmatpush1.bf16.msra.mxu0 %v4009_v25  ;;  %2906 = vmatpush1.bf16.msra.mxu1 %v4013_v30 }
 0x399   :  { %2876 = vmatprep.subr.bf16.mxu0 %v4015_v40  ;;  %2908 = vmatprep.subr.bf16.mxu1 %v4027_v54 }
 0x39c   :  { %2878 = vmatpush1.bf16.msra.mxu0 %v4045_v24  ;;  %2910 = vmatpush1.bf16.msra.mxu1 %v4049_v38 }
 0x39d   :  { %2880 = vmatprep.subr.bf16.mxu0 %v4051_v43  ;;  %2912 = vmatprep.subr.bf16.mxu1 %v4063_v61 }
 0x3a0   :  { %2882 = vmatpush1.bf16.msra.mxu0 %v4081_v63  ;;  %2914 = vmatpush1.bf16.msra.mxu1 %v4085_v31 }
 0x3a1   :  { %2884 = vmatprep.subr.bf16.mxu0 %v4087_v32  ;;  %2916 = vmatprep.subr.bf16.mxu1 %v4096_v35 }
 0x3a4   :  { %2886 = vmatpush1.bf16.msra.mxu0 %v4105_v50  ;;  %2918 = vmatpush1.bf16.msra.mxu1 %v4109_v62 }
 0x3a5   :  { %2920 = vmatprep.subr.bf16.mxu0 %v3835_v15  ;;  %2952 = vmatprep.subr.bf16.mxu1 %v3846_v26 }
 0x45a   :  { %v1298_v51 = vpop.f32.mrb[6].mxu0  ;;  %v1369_v12 = vpop.f32.mrb[6].mxu1 }
 0x45b   :  { %v3117_v5 = vadd.f32 %v1298_v51, %v3750_v6  ;;  %v1300_v53 = vpop.f32.mrb[7].mxu0  ;;  %v1371_v3 = vpop.f32.mrb[7].mxu1  ;;  %v3133_v15 = vadd.f32 %v1369_v12, %v3756_v33 }
 0x45c   :  { %v3118_v4 = vadd.f32 %v1300_v53, %v3752_v10  ;;  %v3134_v41 = vadd.f32 %v1371_v3, %v3759_v55 }
 0x45d   :  { %v2564_v7 = vmul.f32 -1.442695, %v3117_v5  ;;  %v2566_v26 = vmul.f32 -1.442695, %v3133_v15 }
 0x45e   :  { %v2565_v20 = vmul.f32 -1.442695, %v3118_v4  ;;  %v2567_v4 = vmul.f32 -1.442695, %v3134_v41 }
 0x45f   :  { %3232 = vpow2.f32 %v2564_v7 }
 0x460   :  { %3234 = vpow2.f32 %v2565_v20 }
 0x469   :  { %v3233_v21 = vpop.eup %3232 }
 0x46a   :  { %v1386_v46 = vadd.f32 1.0, %v3233_v21  ;;  %v3235_v59 = vpop.eup %3234 }
 0x46b   :  { %v1387_v60 = vadd.f32 1.0, %v3235_v59 }
 0x46c   :  { %3236 = vrcp.f32 %v1386_v46 }
 0x46d   :  { %3238 = vrcp.f32 %v1387_v60 }
 0x46e   :  { %3240 = vpow2.f32 %v2566_v26 }
 0x46f   :  { %3242 = vpow2.f32 %v2567_v4 }
 0x476   :  { %v3237_v13 = vpop.eup %3236 }
 0x477   :  { %v1398_v17 = vmul.f32 2.0, %v3237_v13  ;;  %v3239_v22 = vpop.eup %3238 }
 0x478   :  { %v1402_v34 = vmul.f32 -0.00015625, %v3239_v22  ;;  %v3241_v5 = vpop.eup %3240 }
 0x479   :  { %v2568_v23 = vadd.f32 -1.0, %v1398_v17  ;;  %v1388_v20 = vadd.f32 1.0, %v3241_v5 }
 0x47a   :  { %v1403_v47 = vadd.f32 1.0, %v1402_v34 }
 0x47b   :  { %v1400_v36 = vmul.f32 -7.8125e-05, %v2568_v23  ;;  %3244 = vrcp.f32 %v1388_v20 }
 0x47c   :  { %v1405_v52 = vsub.f32 1.0, %v1403_v47  ;;  %v1404_v16 = vmul.f32 0.1, %v1403_v47 }
 0x47d   :  { %v1401_v49 = vadd.f32 1.0, %v1400_v36  ;;  %v3243_v36 = vpop.eup %3242 }
 0x47e   :  { %v1406_v1 = vmul.f32 %v3239_v22, %v1405_v52 }
 0x47f   :  { %v1411_v14 = vsub.f32 1.0, %v1401_v49  ;;  %v1410_v21 = vmul.f32 %v2568_v23, %v1401_v49 }
 0x480   :  { %v1407_v51 = vadd.f32 %v1406_v1, %v1404_v16  ;;  %v1389_v16 = vadd.f32 1.0, %v3243_v36 }
 0x481   :  { %v1412_v12 = vmul.f32 %v1411_v14, %v4126_v45 }
 0x482   :  { %v1408_v53 = vmul.f32 1.8, %v1407_v51  ;;  %3246 = vrcp.f32 %v1389_v16 }
 0x483   :  { %v1413_v59 = vadd.f32 %v1412_v12, %v1410_v21 }
 0x484   :  { %v1409_v7 = vadd.f32 0.04, %v1408_v53 }
 0x485   :  { %v3245_v45 = vpop.eup %3244 }
 0x486   :  { %v1414_v46 = vmul.f32 %v3239_v22, %v1409_v7  ;;  %v1425_v23 = vmul.f32 %v3245_v45, %v4123_v11 }
 0x488   :  { %v1415_v60 = vmul.f32 0.01, %v1414_v46 }
 0x48a   :  { %v1416_v15 = vsub.f32 %v1413_v59, %v1415_v60 }
 0x48c   :  { %v1417_v26 = vsub.f32 %v1416_v15, %v1409_v7  ;;  %v1421_v3 = vmul.f32 0.99004984, %v1416_v15  ;;  %v3247_v14 = vpop.eup %3246 }
 0x48e   :  { %vm1418_vm5 = vcmp.gt.f32.partialorder %v1417_v26, 0.0 }
 0x48f   :  { %v2569_v13 = vsel %vm1418_vm5, 1.0, %v3322_v2 }
 0x490   :  { %v1422_v17 = vmul.f32 0.009950167, %v2569_v13  ;;  %v1426_v34 = vmul.f32 %v3239_v22, %v2569_v13 }
 0x492   :  { %v1423_v47 = vadd.f32 %v1422_v17, %v1421_v3 }
 0x494   :  { %v1424_v52 = vadd.f32 0.08, %v1423_v47 }
 0x496   :  { %v1427_v49 = vmul.f32 %v1426_v34, %v1424_v52 }
 0x498   :  { %v4175_v1 = vadd.f32 %v1427_v49, %v1425_v23 }
 0x49a   :  { %3248 = vtanh.f32 %v4175_v1 }
 0x4a4   :  { %v3249_v41 = vpop.eup %3248 }
 0x4a5   :  { %v4178_v51 = vmul.f32 %v3249_v41, %v3247_v14  ;;  %v1978_v14 = vld [vmem:[%s4605_s3 + $0x28] sm:$0xff]  ;;  %v1976_v41 = vld [vmem:[%s4605_s3 + $0x18] sm:$0xff] }
 0x4a7   :  { %2570 = vst [vmem:[%s4607_s4 + $0x18] sm:$0xff] %v4178_v51  ;;  %1567 = vmatmul.mubr.f32.vlgmr.msra.gmra.mrb[8].mxu0 %v4178_v51  ;;  %1638 = vmatmul.mubr.f32.vlgmr.msra.gmra.mrb[8].mxu1 %v4178_v51 }
 0x4a8   :  { %2922 = vmatpush1.bf16.msra.mxu0 %v3848_v29  ;;  %2954 = vmatpush1.bf16.msra.mxu1 %v3860_v44 }
 0x4a9   :  { %2924 = vmatprep.subr.bf16.mxu0 %v3873_v57  ;;  %2956 = vmatprep.subr.bf16.mxu1 %v3875_v58 }
 0x4aa   :  { %1836 = vmatprep.mubr.f32.mxu0 %v3322_v2  ;;  %1907 = vmatprep.mubr.f32.mxu1 %v3322_v2 }
 0x4ac   :  { %2926 = vmatpush1.bf16.msra.mxu0 %v3887_v8  ;;  %2958 = vmatpush1.bf16.msra.mxu1 %v3900_v27 }
 0x4ad   :  { %2928 = vmatprep.subr.bf16.mxu0 %v3902_v37  ;;  %2960 = vmatprep.subr.bf16.mxu1 %v3913_v56 }
 0x4b0   :  { %2930 = vmatpush1.bf16.msra.mxu0 %v3925_v42  ;;  %2962 = vmatpush1.bf16.msra.mxu1 %v3938_v18 }
 0x4b1   :  { %2932 = vmatprep.subr.bf16.mxu0 %v3940_v19  ;;  %2964 = vmatprep.subr.bf16.mxu1 %v3952_v28 }
 0x4b4   :  { %2934 = vmatpush1.bf16.msra.mxu0 %v3973_v9  ;;  %2966 = vmatpush1.bf16.msra.mxu1 %v3977_v39 }
 0x4b5   :  { %2936 = vmatprep.subr.bf16.mxu0 %v3979_v48  ;;  %2968 = vmatprep.subr.bf16.mxu1 %v3991_v0 }
 0x4b8   :  { %2938 = vmatpush1.bf16.msra.mxu0 %v4009_v25  ;;  %2970 = vmatpush1.bf16.msra.mxu1 %v4013_v30 }
 0x4b9   :  { %2940 = vmatprep.subr.bf16.mxu0 %v4015_v40  ;;  %2972 = vmatprep.subr.bf16.mxu1 %v4027_v54 }
 0x4bc   :  { %2942 = vmatpush1.bf16.msra.mxu0 %v4045_v24  ;;  %2974 = vmatpush1.bf16.msra.mxu1 %v4049_v38 }
 0x4bd   :  { %2944 = vmatprep.subr.bf16.mxu0 %v4051_v43  ;;  %2976 = vmatprep.subr.bf16.mxu1 %v4063_v61 }
 0x4c0   :  { %2946 = vmatpush1.bf16.msra.mxu0 %v4081_v63  ;;  %2978 = vmatpush1.bf16.msra.mxu1 %v4085_v31 }
 0x4c1   :  { %2948 = vmatprep.subr.bf16.mxu0 %v4087_v32  ;;  %2980 = vmatprep.subr.bf16.mxu1 %v4096_v35 }
 0x4c4   :  { %2950 = vmatpush1.bf16.msra.mxu0 %v4105_v50  ;;  %2982 = vmatpush1.bf16.msra.mxu1 %v4109_v62 }
 0x57a   :  { %v1568_v29 = vpop.f32.mrb[8].mxu0  ;;  %v1639_v44 = vpop.f32.mrb[8].mxu1 }
 0x57b   :  { %v3119_v57 = vadd.f32 %v1568_v29, %v3750_v6  ;;  %v1570_v58 = vpop.f32.mrb[9].mxu0  ;;  %v1641_v8 = vpop.f32.mrb[9].mxu1  ;;  %v3135_v9 = vadd.f32 %v1639_v44, %v3756_v33  ;;  %v1980_v29 = vld [vmem:[%s4605_s3 + $0x38] sm:$0xff]  ;;  %v1973_v44 = vld [vmem:[%s4605_s3] sm:$0xff] }
 0x57c   :  { %v3120_v27 = vadd.f32 %v1570_v58, %v3752_v10  ;;  %v3136_v32 = vadd.f32 %v1641_v8, %v3759_v55  ;;  %v4258_v58 = vpack.c.bf16 %v1980_v29, %v1976_v41  ;;  %v2018_v41 = vld [vmem:[%s4605_s3 + $0x168] sm:$0xff]  ;;  %v2016_v29 = vld [vmem:[%s4605_s3 + $0x158] sm:$0xff] }
 0x57d   :  { %v2571_v37 = vmul.f32 -1.442695, %v3119_v57  ;;  %v2573_v39 = vmul.f32 -1.442695, %v3135_v9  ;;  %v1977_v57 = vld [vmem:[%s4605_s3 + $0x20] sm:$0xff] }
 0x57e   :  { %v2572_v56 = vmul.f32 -1.442695, %v3120_v27  ;;  %v2574_v22 = vmul.f32 -1.442695, %v3136_v32  ;;  %v4260_v8 = vpack.c.bf16 %v1977_v57, %v1973_v44  ;;  %v1975_v27 = vld [vmem:[%s4605_s3 + $0x10] sm:$0xff]  ;;  %3016 = vmatprep.subr.bf16.mxu1 %v4258_v58  ;;  %v2020_v44 = vld [vmem:[%s4605_s3 + $0x178] sm:$0xff] }
 0x57f   :  { %3250 = vpow2.f32 %v2571_v37  ;;  %v1979_v37 = vld [vmem:[%s4605_s3 + $0x30] sm:$0xff] }
 0x580   :  { %3252 = vpow2.f32 %v2572_v56  ;;  %v1982_v56 = vld [vmem:[%s4605_s3 + $0x48] sm:$0xff] }
 0x589   :  { %v3251_v42 = vpop.eup %3250 }
 0x58a   :  { %v1656_v18 = vadd.f32 1.0, %v3251_v42  ;;  %v3253_v19 = vpop.eup %3252  ;;  %v4272_v42 = vpack.c.bf16 %v1979_v37, %v1975_v27 }
 0x58b   :  { %v1657_v28 = vadd.f32 1.0, %v3253_v19  ;;  %v1984_v19 = vld [vmem:[%s4605_s3 + $0x58] sm:$0xff] }
 0x58c   :  { %3254 = vrcp.f32 %v1656_v18  ;;  %v1986_v18 = vld [vmem:[%s4605_s3 + $0x68] sm:$0xff] }
 0x58d   :  { %3256 = vrcp.f32 %v1657_v28  ;;  %v1988_v28 = vld [vmem:[%s4605_s3 + $0x78] sm:$0xff]  ;;  %v4285_v9 = vpack.c.bf16 %v1986_v18, %v1982_v56  ;;  %v2013_v56 = vld [vmem:[%s4605_s3 + $0x140] sm:$0xff] }
 0x58e   :  { %3258 = vpow2.f32 %v2573_v39  ;;  %v4287_v39 = vpack.c.bf16 %v1988_v28, %v1984_v19  ;;  %v2017_v18 = vld [vmem:[%s4605_s3 + $0x160] sm:$0xff]  ;;  %v2015_v19 = vld [vmem:[%s4605_s3 + $0x150] sm:$0xff]  ;;  %v4439_v28 = vpack.c.bf16 %v2020_v44, %v2016_v29 }
 0x58f   :  { %3260 = vpow2.f32 %v2574_v22  ;;  %v1998_v22 = vld [vmem:[%s4605_s3 + $0xc8] sm:$0xff] }
 0x596   :  { %v3255_v48 = vpop.eup %3254 }
 0x597   :  { %v1668_v0 = vmul.f32 2.0, %v3255_v48  ;;  %v3257_v25 = vpop.eup %3256  ;;  %v1981_v48 = vld [vmem:[%s4605_s3 + $0x40] sm:$0xff] }
 0x598   :  { %v1672_v40 = vmul.f32 -0.00015625, %v3257_v25  ;;  %v3259_v50 = vpop.eup %3258 }
 0x599   :  { %v2575_v30 = vadd.f32 -1.0, %v1668_v0  ;;  %v1658_v53 = vadd.f32 1.0, %v3259_v50  ;;  %v3261_v13 = vpop.eup %3260  ;;  %v1985_v0 = vld [vmem:[%s4605_s3 + $0x60] sm:$0xff]  ;;  %v1991_v50 = vld [vmem:[%s4605_s3 + $0x90] sm:$0xff] }
 0x59a   :  { %v1673_v24 = vadd.f32 1.0, %v1672_v40  ;;  %v1659_v36 = vadd.f32 1.0, %v3261_v13  ;;  %v1987_v40 = vld [vmem:[%s4605_s3 + $0x70] sm:$0xff]  ;;  %v2008_v13 = vld [vmem:[%s4605_s3 + $0x118] sm:$0xff] }
 0x59b   :  { %v1670_v54 = vmul.f32 -7.8125e-05, %v2575_v30  ;;  %3262 = vrcp.f32 %v1658_v53  ;;  %v2000_v53 = vld [vmem:[%s4605_s3 + $0xd8] sm:$0xff] }
 0x59c   :  { %v1675_v43 = vsub.f32 1.0, %v1673_v24  ;;  %v1674_v61 = vmul.f32 0.1, %v1673_v24  ;;  %3264 = vrcp.f32 %v1659_v36  ;;  %v1994_v24 = vld [vmem:[%s4605_s3 + $0xa8] sm:$0xff] }
 0x59d   :  { %v1671_v38 = vadd.f32 1.0, %v1670_v54  ;;  %v1990_v54 = vld [vmem:[%s4605_s3 + $0x88] sm:$0xff] }
 0x59e   :  { %v1676_v63 = vmul.f32 %v3257_v25, %v1675_v43  ;;  %v4314_v43 = vpack.c.bf16 %v1994_v24, %v1990_v54  ;;  %v2028_v54 = vld [vmem:[%s4605_s3 + $0x1b8] sm:$0xff]  ;;  %v4457_v24 = vpack.c.bf16 %v2017_v18, %v2013_v56 }
 0x59f   :  { %v1681_v31 = vsub.f32 1.0, %v1671_v38  ;;  %v1680_v12 = vmul.f32 %v2575_v30, %v1671_v38  ;;  %v4299_v30 = vpack.c.bf16 %v1985_v0, %v1981_v48  ;;  %v2019_v48 = vld [vmem:[%s4605_s3 + $0x170] sm:$0xff]  ;;  %v2022_v0 = vld [vmem:[%s4605_s3 + $0x188] sm:$0xff] }
 0x5a0   :  { %v1677_v35 = vadd.f32 %v1676_v63, %v1674_v61  ;;  %v1992_v61 = vld [vmem:[%s4605_s3 + $0x98] sm:$0xff] }
 0x5a1   :  { %v1682_v11 = vmul.f32 %v1681_v31, %v4178_v51  ;;  %v1996_v63 = vld [vmem:[%s4605_s3 + $0xb8] sm:$0xff]  ;;  %v1989_v31 = vld [vmem:[%s4605_s3 + $0x80] sm:$0xff] }
 0x5a2   :  { %v1678_v62 = vmul.f32 1.8, %v1677_v35  ;;  %v4325_v32 = vpack.c.bf16 %v1996_v63, %v1992_v61  ;;  %v1993_v35 = vld [vmem:[%s4605_s3 + $0xa0] sm:$0xff]  ;;  %v4461_v61 = vpack.c.bf16 %v2019_v48, %v2015_v19 }
 0x5a3   :  { %v1683_v7 = vadd.f32 %v1682_v11, %v1680_v12  ;;  %v4337_v11 = vpack.c.bf16 %v1993_v35, %v1989_v31  ;;  %v2021_v31 = vld [vmem:[%s4605_s3 + $0x180] sm:$0xff] }
 0x5a4   :  { %v1679_v5 = vadd.f32 0.04, %v1678_v62  ;;  %v1995_v62 = vld [vmem:[%s4605_s3 + $0xb0] sm:$0xff]  ;;  %v2025_v35 = vld [vmem:[%s4605_s3 + $0x1a0] sm:$0xff] }
 0x5a5   :  { %v3263_v17 = vpop.eup %3262  ;;  %v4350_v12 = vpack.c.bf16 %v1995_v62, %v1991_v50  ;;  %v2023_v50 = vld [vmem:[%s4605_s3 + $0x190] sm:$0xff] }
 0x5a6   :  { %v1684_v4 = vmul.f32 %v3257_v25, %v1679_v5  ;;  %v1695_v47 = vmul.f32 %v3263_v17, %v4175_v1  ;;  %v3265_v16 = vpop.eup %3264  ;;  %v1974_v1 = vld [vmem:[%s4605_s3 + $0x8] sm:$0xff] }
 0x5a7   :  { %v4247_v51 = vpack.c.bf16 %v1978_v14, %v1974_v1  ;;  %v2011_v1 = vld [vmem:[%s4605_s3 + $0x130] sm:$0xff]  ;;  %v2014_v14 = vld [vmem:[%s4605_s3 + $0x148] sm:$0xff] }
 0x5a8   :  { %v1685_v20 = vmul.f32 0.01, %v1684_v4  ;;  %v4427_v37 = vpack.c.bf16 %v2018_v41, %v2014_v14 }
 0x5a9   :  { %2984 = vmatprep.subr.bf16.mxu0 %v4247_v51 }
 0x5aa   :  { %v1686_v21 = vsub.f32 %v1683_v7, %v1685_v20  ;;  %v2004_v7 = vld [vmem:[%s4605_s3 + $0xf8] sm:$0xff]  ;;  %v1997_v20 = vld [vmem:[%s4605_s3 + $0xc0] sm:$0xff] }
 0x5ac   :  { %v1687_v46 = vsub.f32 %v1686_v21, %v1679_v5  ;;  %v1691_v60 = vmul.f32 0.99004984, %v1686_v21  ;;  %v2002_v5 = vld [vmem:[%s4605_s3 + $0xe8] sm:$0xff]  ;;  %v2001_v21 = vld [vmem:[%s4605_s3 + $0xe0] sm:$0xff] }
 0x5ad   :  { %v4352_v4 = vpack.c.bf16 %v2002_v5, %v1998_v22  ;;  %v4385_v17 = vpack.c.bf16 %v2001_v21, %v1997_v20  ;;  %v2027_v22 = vld [vmem:[%s4605_s3 + $0x1b0] sm:$0xff]  ;;  %v2030_v5 = vld [vmem:[%s4605_s3 + $0x1c8] sm:$0xff]  ;;  %v2036_v20 = vld [vmem:[%s4605_s3 + $0x1f8] sm:$0xff]  ;;  %v4493_v21 = vpack.c.bf16 %v2025_v35, %v2021_v31 }
 0x5ae   :  { %vm1688_vm6 = vcmp.gt.f32.partialorder %v1687_v46, 0.0  ;;  %v4364_v46 = vpack.c.bf16 %v2004_v7, %v2000_v53  ;;  %v2034_v53 = vld [vmem:[%s4605_s3 + $0x1e8] sm:$0xff]  ;;  %v2032_v7 = vld [vmem:[%s4605_s3 + $0x1d8] sm:$0xff] }
 0x5af   :  { %v2576_v59 = vsel %vm1688_vm6, 1.0, %v3322_v2 }
 0x5b0   :  { %v1692_v15 = vmul.f32 0.009950167, %v2576_v59  ;;  %v1696_v26 = vmul.f32 %v3257_v25, %v2576_v59  ;;  %v1983_v25 = vld [vmem:[%s4605_s3 + $0x50] sm:$0xff] }
 0x5b1   :  { %v4312_v38 = vpack.c.bf16 %v1987_v40, %v1983_v25  ;;  %v1999_v59 = vld [vmem:[%s4605_s3 + $0xd0] sm:$0xff]  ;;  %v2026_v25 = vld [vmem:[%s4605_s3 + $0x1a8] sm:$0xff]  ;;  %v2024_v40 = vld [vmem:[%s4605_s3 + $0x198] sm:$0xff] }
 0x5b2   :  { %v1693_v3 = vadd.f32 %v1692_v15, %v1691_v60  ;;  %v2003_v60 = vld [vmem:[%s4605_s3 + $0xf0] sm:$0xff]  ;;  %v2006_v15 = vld [vmem:[%s4605_s3 + $0x108] sm:$0xff]  ;;  %v4463_v63 = vpack.c.bf16 %v2026_v25, %v2022_v0  ;;  %v4475_v62 = vpack.c.bf16 %v2028_v54, %v2024_v40 }
 0x5b4   :  { %v1694_v34 = vadd.f32 0.08, %v1693_v3  ;;  %v2012_v3 = vld [vmem:[%s4605_s3 + $0x138] sm:$0xff] }
 0x5b6   :  { %v1697_v45 = vmul.f32 %v1696_v26, %v1694_v34  ;;  %v2010_v26 = vld [vmem:[%s4605_s3 + $0x128] sm:$0xff]  ;;  %v4389_v34 = vpack.c.bf16 %v2003_v60, %v1999_v59  ;;  %v4497_v59 = vpack.c.bf16 %v2027_v22, %v2023_v50  ;;  %v4499_v60 = vpack.c.bf16 %v2034_v53, %v2030_v5 }
 0x5b7   :  { %v4391_v36 = vpack.c.bf16 %v2010_v26, %v2006_v15  ;;  %v2029_v15 = vld [vmem:[%s4605_s3 + $0x1c0] sm:$0xff] }
 0x5b8   :  { %v4225_v52 = vadd.f32 %v1697_v45, %v1695_v47  ;;  %v2005_v47 = vld [vmem:[%s4605_s3 + $0x100] sm:$0xff] }
 0x5b9   :  { %v2009_v45 = vld [vmem:[%s4605_s3 + $0x120] sm:$0xff] }
 0x5ba   :  { %3266 = vtanh.f32 %v4225_v52  ;;  %v4421_v57 = vpack.c.bf16 %v2009_v45, %v2005_v47  ;;  %v2033_v26 = vld [vmem:[%s4605_s3 + $0x1e0] sm:$0xff]  ;;  %v2035_v47 = vld [vmem:[%s4605_s3 + $0x1f0] sm:$0xff] }
 0x5bb   :  { %v4517_v45 = vpack.c.bf16 %v2033_v26, %v2029_v15 }
 0x5c4   :  { %v3267_v23 = vpop.eup %3266 }
 0x5c5   :  { %v4228_v49 = vmul.f32 %v3267_v23, %v3265_v16  ;;  %v2007_v16 = vld [vmem:[%s4605_s3 + $0x110] sm:$0xff]  ;;  %v4403_v23 = vpack.c.bf16 %v2012_v3, %v2008_v13  ;;  %v4508_v13 = vpack.c.bf16 %v2036_v20, %v2032_v7 }
 0x5c6   :  { %v4425_v27 = vpack.c.bf16 %v2011_v1, %v2007_v16  ;;  %v2031_v3 = vld [vmem:[%s4605_s3 + $0x1d0] sm:$0xff] }
 0x5c7   :  { %2577 = vst [vmem:[%s4607_s4 + $0x20] sm:$0xff] %v4228_v49  ;;  %1837 = vmatmul.mubr.f32.vlgmr.msra.gmra.mrb[10].mxu0 %v4228_v49  ;;  %1908 = vmatmul.mubr.f32.vlgmr.msra.gmra.mrb[10].mxu1 %v4228_v49  ;;  %v4521_v16 = vpack.c.bf16 %v2035_v47, %v2031_v3 }
 0x5c8   :  { %2106 = vmatprep.mubr.f32.mxu0 %v3322_v2  ;;  %2177 = vmatprep.mubr.f32.mxu1 %v3322_v2 }
 0x5c9   :  { %2986 = vmatpush1.bf16.msra.mxu0 %v4260_v8  ;;  %3018 = vmatpush1.bf16.msra.mxu1 %v4272_v42 }
 0x5ca   :  { %2988 = vmatprep.subr.bf16.mxu0 %v4285_v9  ;;  %3020 = vmatprep.subr.bf16.mxu1 %v4287_v39 }
 0x5cd   :  { %2990 = vmatpush1.bf16.msra.mxu0 %v4299_v30  ;;  %3022 = vmatpush1.bf16.msra.mxu1 %v4312_v38 }
 0x5ce   :  { %2992 = vmatprep.subr.bf16.mxu0 %v4314_v43  ;;  %3024 = vmatprep.subr.bf16.mxu1 %v4325_v32 }
 0x5d1   :  { %2994 = vmatpush1.bf16.msra.mxu0 %v4337_v11  ;;  %3026 = vmatpush1.bf16.msra.mxu1 %v4350_v12 }
 0x5d2   :  { %2996 = vmatprep.subr.bf16.mxu0 %v4352_v4  ;;  %3028 = vmatprep.subr.bf16.mxu1 %v4364_v46 }
 0x5d5   :  { %2998 = vmatpush1.bf16.msra.mxu0 %v4385_v17  ;;  %3030 = vmatpush1.bf16.msra.mxu1 %v4389_v34 }
 0x5d6   :  { %3000 = vmatprep.subr.bf16.mxu0 %v4391_v36  ;;  %3032 = vmatprep.subr.bf16.mxu1 %v4403_v23 }
 0x5d9   :  { %3002 = vmatpush1.bf16.msra.mxu0 %v4421_v57  ;;  %3034 = vmatpush1.bf16.msra.mxu1 %v4425_v27 }
 0x5da   :  { %3004 = vmatprep.subr.bf16.mxu0 %v4427_v37  ;;  %3036 = vmatprep.subr.bf16.mxu1 %v4439_v28 }
 0x5dd   :  { %3006 = vmatpush1.bf16.msra.mxu0 %v4457_v24  ;;  %3038 = vmatpush1.bf16.msra.mxu1 %v4461_v61 }
 0x5de   :  { %3008 = vmatprep.subr.bf16.mxu0 %v4463_v63  ;;  %3040 = vmatprep.subr.bf16.mxu1 %v4475_v62 }
 0x5e1   :  { %3010 = vmatpush1.bf16.msra.mxu0 %v4493_v21  ;;  %3042 = vmatpush1.bf16.msra.mxu1 %v4497_v59 }
 0x5e2   :  { %3012 = vmatprep.subr.bf16.mxu0 %v4499_v60  ;;  %3044 = vmatprep.subr.bf16.mxu1 %v4508_v13 }
 0x5e5   :  { %3014 = vmatpush1.bf16.msra.mxu0 %v4517_v45  ;;  %3046 = vmatpush1.bf16.msra.mxu1 %v4521_v16 }
 0x5e6   :  { %3048 = vmatprep.subr.bf16.mxu0 %v4247_v51  ;;  %3080 = vmatprep.subr.bf16.mxu1 %v4258_v58 }
 0x69a   :  { %v1838_v1 = vpop.f32.mrb[10].mxu0  ;;  %v1909_v14 = vpop.f32.mrb[10].mxu1 }
 0x69b   :  { %v3121_v41 = vadd.f32 %v1838_v1, %v3750_v6  ;;  %v1840_v29 = vpop.f32.mrb[11].mxu0  ;;  %v1911_v44 = vpop.f32.mrb[11].mxu1  ;;  %v3137_v51 = vadd.f32 %v1909_v14, %v3756_v33 }
 0x69c   :  { %v3122_v56 = vadd.f32 %v1840_v29, %v3752_v10  ;;  %v3138_v47 = vadd.f32 %v1911_v44, %v3759_v55 }
 0x69d   :  { %v2578_v18 = vmul.f32 -1.442695, %v3121_v41  ;;  %v2580_v58 = vmul.f32 -1.442695, %v3137_v51 }
 0x69e   :  { %v2579_v19 = vmul.f32 -1.442695, %v3122_v56  ;;  %v2581_v56 = vmul.f32 -1.442695, %v3138_v47 }
 0x69f   :  { %3268 = vpow2.f32 %v2578_v18 }
 0x6a0   :  { %3270 = vpow2.f32 %v2579_v19 }
 0x6a9   :  { %v3269_v48 = vpop.eup %3268 }
 0x6aa   :  { %v1926_v0 = vadd.f32 1.0, %v3269_v48  ;;  %v3271_v25 = vpop.eup %3270 }
 0x6ab   :  { %v1927_v40 = vadd.f32 1.0, %v3271_v25 }
 0x6ac   :  { %3272 = vrcp.f32 %v1926_v0 }
 0x6ad   :  { %3274 = vrcp.f32 %v1927_v40 }
 0x6ae   :  { %3276 = vpow2.f32 %v2580_v58 }
 0x6af   :  { %3278 = vpow2.f32 %v2581_v56 }
 0x6b6   :  { %v3273_v54 = vpop.eup %3272 }
 0x6b7   :  { %v1938_v31 = vmul.f32 2.0, %v3273_v54  ;;  %v3275_v35 = vpop.eup %3274 }
 0x6b8   :  { %v1942_v22 = vmul.f32 -0.00015625, %v3275_v35  ;;  %v3277_v41 = vpop.eup %3276 }
 0x6b9   :  { %v2582_v50 = vadd.f32 -1.0, %v1938_v31  ;;  %v1928_v19 = vadd.f32 1.0, %v3277_v41 }
 0x6ba   :  { %v1943_v53 = vadd.f32 1.0, %v1942_v22 }
 0x6bb   :  { %v1940_v5 = vmul.f32 -7.8125e-05, %v2582_v50  ;;  %3280 = vrcp.f32 %v1928_v19 }
 0x6bc   :  { %v1945_v20 = vsub.f32 1.0, %v1943_v53  ;;  %v1944_v15 = vmul.f32 0.1, %v1943_v53 }
 0x6bd   :  { %v1941_v7 = vadd.f32 1.0, %v1940_v5  ;;  %v3279_v5 = vpop.eup %3278 }
 0x6be   :  { %v1946_v26 = vmul.f32 %v3275_v35, %v1945_v20 }
 0x6bf   :  { %v1951_v3 = vsub.f32 1.0, %v1941_v7  ;;  %v1950_v48 = vmul.f32 %v2582_v50, %v1941_v7 }
 0x6c0   :  { %v1947_v1 = vadd.f32 %v1946_v26, %v1944_v15  ;;  %v1929_v15 = vadd.f32 1.0, %v3279_v5 }
 0x6c1   :  { %v1952_v14 = vmul.f32 %v1951_v3, %v4228_v49 }
 0x6c2   :  { %v1948_v29 = vmul.f32 1.8, %v1947_v1  ;;  %3282 = vrcp.f32 %v1929_v15 }
 0x6c3   :  { %v1953_v25 = vadd.f32 %v1952_v14, %v1950_v48 }
 0x6c4   :  { %v1949_v18 = vadd.f32 0.04, %v1948_v29 }
 0x6c5   :  { %v3281_v49 = vpop.eup %3280 }
 0x6c6   :  { %v1954_v0 = vmul.f32 %v3275_v35, %v1949_v18  ;;  %v1965_v50 = vmul.f32 %v3281_v49, %v4225_v52 }
 0x6c8   :  { %v1955_v40 = vmul.f32 0.01, %v1954_v0 }
 0x6ca   :  { %v1956_v51 = vsub.f32 %v1953_v25, %v1955_v40 }
 0x6cc   :  { %v1957_v58 = vsub.f32 %v1956_v51, %v1949_v18  ;;  %v1961_v44 = vmul.f32 0.99004984, %v1956_v51  ;;  %v3283_v3 = vpop.eup %3282 }
 0x6ce   :  { %vm1958_vm7 = vcmp.gt.f32.partialorder %v1957_v58, 0.0 }
 0x6cf   :  { %v2583_v54 = vsel %vm1958_vm7, 1.0, %v3322_v2 }
 0x6d0   :  { %v1962_v31 = vmul.f32 0.009950167, %v2583_v54  ;;  %v1966_v22 = vmul.f32 %v3275_v35, %v2583_v54 }
 0x6d2   :  { %v1963_v53 = vadd.f32 %v1962_v31, %v1961_v44 }
 0x6d4   :  { %v1964_v20 = vadd.f32 0.08, %v1963_v53 }
 0x6d6   :  { %v1967_v7 = vmul.f32 %v1966_v22, %v1964_v20 }
 0x6d8   :  { %v4535_v26 = vadd.f32 %v1967_v7, %v1965_v50 }
 0x6da   :  { %3284 = vtanh.f32 %v4535_v26 }
 0x6e4   :  { %v3285_v47 = vpop.eup %3284 }
 0x6e5   :  { %v4538_v1 = vmul.f32 %v3285_v47, %v3283_v3 }
 0x6e7   :  { %2584 = vst [vmem:[%s4607_s4 + $0x28] sm:$0xff] %v4538_v1  ;;  %2107 = vmatmul.mubr.f32.vlgmr.msra.gmra.mrb[12].mxu0 %v4538_v1  ;;  %2178 = vmatmul.mubr.f32.vlgmr.msra.gmra.mrb[12].mxu1 %v4538_v1 }
 0x6e8   :  { %3050 = vmatpush1.bf16.msra.mxu0 %v4260_v8  ;;  %3082 = vmatpush1.bf16.msra.mxu1 %v4272_v42 }
 0x6e9   :  { %3052 = vmatprep.subr.bf16.mxu0 %v4285_v9  ;;  %3084 = vmatprep.subr.bf16.mxu1 %v4287_v39 }
 0x6ea   :  { %2376 = vmatprep.mubr.f32.mxu0 %v3322_v2  ;;  %2447 = vmatprep.mubr.f32.mxu1 %v3322_v2 }
 0x6ec   :  { %3054 = vmatpush1.bf16.msra.mxu0 %v4299_v30  ;;  %3086 = vmatpush1.bf16.msra.mxu1 %v4312_v38 }
 0x6ed   :  { %3056 = vmatprep.subr.bf16.mxu0 %v4314_v43  ;;  %3088 = vmatprep.subr.bf16.mxu1 %v4325_v32 }
 0x6f0   :  { %3058 = vmatpush1.bf16.msra.mxu0 %v4337_v11  ;;  %3090 = vmatpush1.bf16.msra.mxu1 %v4350_v12 }
 0x6f1   :  { %3060 = vmatprep.subr.bf16.mxu0 %v4352_v4  ;;  %3092 = vmatprep.subr.bf16.mxu1 %v4364_v46 }
 0x6f4   :  { %3062 = vmatpush1.bf16.msra.mxu0 %v4385_v17  ;;  %3094 = vmatpush1.bf16.msra.mxu1 %v4389_v34 }
 0x6f5   :  { %3064 = vmatprep.subr.bf16.mxu0 %v4391_v36  ;;  %3096 = vmatprep.subr.bf16.mxu1 %v4403_v23 }
 0x6f8   :  { %3066 = vmatpush1.bf16.msra.mxu0 %v4421_v57  ;;  %3098 = vmatpush1.bf16.msra.mxu1 %v4425_v27 }
 0x6f9   :  { %3068 = vmatprep.subr.bf16.mxu0 %v4427_v37  ;;  %3100 = vmatprep.subr.bf16.mxu1 %v4439_v28 }
 0x6fc   :  { %3070 = vmatpush1.bf16.msra.mxu0 %v4457_v24  ;;  %3102 = vmatpush1.bf16.msra.mxu1 %v4461_v61 }
 0x6fd   :  { %3072 = vmatprep.subr.bf16.mxu0 %v4463_v63  ;;  %3104 = vmatprep.subr.bf16.mxu1 %v4475_v62 }
 0x700   :  { %3074 = vmatpush1.bf16.msra.mxu0 %v4493_v21  ;;  %3106 = vmatpush1.bf16.msra.mxu1 %v4497_v59 }
 0x701   :  { %3076 = vmatprep.subr.bf16.mxu0 %v4499_v60  ;;  %3108 = vmatprep.subr.bf16.mxu1 %v4508_v13 }
 0x704   :  { %3078 = vmatpush1.bf16.msra.mxu0 %v4517_v45  ;;  %3110 = vmatpush1.bf16.msra.mxu1 %v4521_v16 }
 0x7ba   :  { %v2108_v52 = vpop.f32.mrb[12].mxu0  ;;  %v2179_v8 = vpop.f32.mrb[12].mxu1 }
 0x7bb   :  { %v3123_v42 = vadd.f32 %v2108_v52, %v3750_v6  ;;  %v2110_v9 = vpop.f32.mrb[13].mxu0  ;;  %v2181_v39 = vpop.f32.mrb[13].mxu1  ;;  %v3139_v46 = vadd.f32 %v2179_v8, %v3756_v33 }
 0x7bc   :  { %v3124_v30 = vadd.f32 %v2110_v9, %v3752_v10  ;;  %v3140_v59 = vadd.f32 %v2181_v39, %v3759_v55 }
 0x7bd   :  { %v2585_v38 = vmul.f32 -1.442695, %v3123_v42  ;;  %v2587_v17 = vmul.f32 -1.442695, %v3139_v46 }
 0x7be   :  { %v2586_v43 = vmul.f32 -1.442695, %v3124_v30  ;;  %v2588_v35 = vmul.f32 -1.442695, %v3140_v59 }
 0x7bf   :  { %3286 = vpow2.f32 %v2585_v38 }
 0x7c0   :  { %3288 = vpow2.f32 %v2586_v43 }
 0x7c9   :  { %v3287_v32 = vpop.eup %3286 }
 0x7ca   :  { %v2196_v11 = vadd.f32 1.0, %v3287_v32  ;;  %v3289_v12 = vpop.eup %3288 }
 0x7cb   :  { %v2197_v4 = vadd.f32 1.0, %v3289_v12 }
 0x7cc   :  { %3290 = vrcp.f32 %v2196_v11 }
 0x7cd   :  { %3292 = vrcp.f32 %v2197_v4 }
 0x7ce   :  { %3294 = vpow2.f32 %v2587_v17 }
 0x7cf   :  { %3296 = vpow2.f32 %v2588_v35 }
 0x7d6   :  { %v3291_v34 = vpop.eup %3290 }
 0x7d7   :  { %v2208_v36 = vmul.f32 2.0, %v3291_v34  ;;  %v3293_v23 = vpop.eup %3292 }
 0x7d8   :  { %v2212_v27 = vmul.f32 -0.00015625, %v3293_v23  ;;  %v3295_v13 = vpop.eup %3294 }
 0x7d9   :  { %v2589_v57 = vadd.f32 -1.0, %v2208_v36  ;;  %v2198_v29 = vadd.f32 1.0, %v3295_v13  ;;  %v3297_v54 = vpop.eup %3296 }
 0x7da   :  { %v2213_v28 = vadd.f32 1.0, %v2212_v27  ;;  %v2199_v5 = vadd.f32 1.0, %v3297_v54 }
 0x7db   :  { %v2210_v37 = vmul.f32 -7.8125e-05, %v2589_v57  ;;  %3298 = vrcp.f32 %v2198_v29 }
 0x7dc   :  { %v2215_v61 = vsub.f32 1.0, %v2213_v28  ;;  %v2214_v63 = vmul.f32 0.1, %v2213_v28  ;;  %3300 = vrcp.f32 %v2199_v5 }
 0x7dd   :  { %v2211_v24 = vadd.f32 1.0, %v2210_v37 }
 0x7de   :  { %v2216_v62 = vmul.f32 %v3293_v23, %v2215_v61 }
 0x7df   :  { %v2221_v21 = vsub.f32 1.0, %v2211_v24  ;;  %v2220_v14 = vmul.f32 %v2589_v57, %v2211_v24 }
 0x7e0   :  { %v2217_v60 = vadd.f32 %v2216_v62, %v2214_v63 }
 0x7e1   :  { %v2222_v16 = vmul.f32 %v2221_v21, %v4538_v1 }
 0x7e2   :  { %v2218_v45 = vmul.f32 1.8, %v2217_v60 }
 0x7e3   :  { %v2223_v18 = vadd.f32 %v2222_v16, %v2220_v14 }
 0x7e4   :  { %v2219_v41 = vadd.f32 0.04, %v2218_v45 }
 0x7e5   :  { %v3299_v31 = vpop.eup %3298 }
 0x7e6   :  { %v2224_v56 = vmul.f32 %v3293_v23, %v2219_v41  ;;  %v2235_v53 = vmul.f32 %v3299_v31, %v4535_v26  ;;  %v3301_v15 = vpop.eup %3300 }
 0x7e8   :  { %v2225_v19 = vmul.f32 0.01, %v2224_v56 }
 0x7ea   :  { %v2226_v48 = vsub.f32 %v2223_v18, %v2225_v19 }
 0x7ec   :  { %v2227_v0 = vsub.f32 %v2226_v48, %v2219_v41  ;;  %v2231_v40 = vmul.f32 0.99004984, %v2226_v48 }
 0x7ee   :  { %vm2228_vm8 = vcmp.gt.f32.partialorder %v2227_v0, 0.0 }
 0x7ef   :  { %v2590_v25 = vsel %vm2228_vm8, 1.0, %v3322_v2 }
 0x7f0   :  { %v2232_v51 = vmul.f32 0.009950167, %v2590_v25  ;;  %v2236_v58 = vmul.f32 %v3293_v23, %v2590_v25 }
 0x7f2   :  { %v2233_v44 = vadd.f32 %v2232_v51, %v2231_v40 }
 0x7f4   :  { %v2234_v22 = vadd.f32 0.08, %v2233_v44 }
 0x7f6   :  { %v2237_v49 = vmul.f32 %v2236_v58, %v2234_v22 }
 0x7f8   :  { %v4585_v20 = vadd.f32 %v2237_v49, %v2235_v53 }
 0x7fa   :  { %3302 = vtanh.f32 %v4585_v20 }
 0x804   :  { %v3303_v50 = vpop.eup %3302 }
 0x805   :  { %v2240_v7 = vmul.f32 %v3303_v50, %v3301_v15 }
 0x807   :  { %2591 = vst [vmem:[%s4607_s4 + $0x30] sm:$0xff] %v2240_v7  ;;  %2377 = vmatmul.mubr.f32.vlgmr.msra.gmra.mrb[14].mxu0 %v2240_v7  ;;  %2448 = vmatmul.mubr.f32.vlgmr.msra.gmra.mrb[14].mxu1 %v2240_v7 }
 0x8da   :  { %v2378_v3 = vpop.f32.mrb[14].mxu0  ;;  %v2449_v47 = vpop.f32.mrb[14].mxu1 }
 0x8db   :  { %v3125_v1 = vadd.f32 %v2378_v3, %v3750_v6  ;;  %v2380_v26 = vpop.f32.mrb[15].mxu0  ;;  %v2451_v52 = vpop.f32.mrb[15].mxu1  ;;  %v3141_v32 = vadd.f32 %v2449_v47, %v3756_v33 }
 0x8dc   :  { %v3126_v8 = vadd.f32 %v2380_v26, %v3752_v10  ;;  %v3142_v28 = vadd.f32 %v2451_v52, %v3759_v55 }
 0x8dd   :  { %v2592_v42 = vmul.f32 -1.442695, %v3125_v1  ;;  %v2594_v11 = vmul.f32 -1.442695, %v3141_v32 }
 0x8de   :  { %v2593_v9 = vmul.f32 -1.442695, %v3126_v8  ;;  %v2595_v62 = vmul.f32 -1.442695, %v3142_v28 }
 0x8df   :  { %3304 = vpow2.f32 %v2592_v42 }
 0x8e0   :  { %3306 = vpow2.f32 %v2593_v9 }
 0x8e9   :  { %v3305_v39 = vpop.eup %3304 }
 0x8ea   :  { %v2466_v30 = vadd.f32 1.0, %v3305_v39  ;;  %v3307_v38 = vpop.eup %3306 }
 0x8eb   :  { %v2467_v43 = vadd.f32 1.0, %v3307_v38 }
 0x8ec   :  { %3308 = vrcp.f32 %v2466_v30 }
 0x8ed   :  { %3310 = vrcp.f32 %v2467_v43 }
 0x8ee   :  { %3312 = vpow2.f32 %v2594_v11 }
 0x8ef   :  { %3314 = vpow2.f32 %v2595_v62 }
 0x8f6   :  { %v3309_v12 = vpop.eup %3308 }
 0x8f7   :  { %v2478_v4 = vmul.f32 2.0, %v3309_v12  ;;  %v3311_v6 = vpop.eup %3310 }
 0x8f8   :  { %v2482_v17 = vmul.f32 -0.00015625, %v3311_v6  ;;  %v3313_v61 = vpop.eup %3312 }
 0x8f9   :  { %v2596_v46 = vadd.f32 -1.0, %v2478_v4  ;;  %v2468_v59 = vadd.f32 1.0, %v3313_v61  ;;  %v3315_v18 = vpop.eup %3314 }
 0x8fa   :  { %v2483_v34 = vadd.f32 1.0, %v2482_v17  ;;  %v2469_v25 = vadd.f32 1.0, %v3315_v18 }
 0x8fb   :  { %v2480_v10 = vmul.f32 -7.8125e-05, %v2596_v46  ;;  %3316 = vrcp.f32 %v2468_v59 }
 0x8fc   :  { %v2485_v23 = vsub.f32 1.0, %v2483_v34  ;;  %v2484_v57 = vmul.f32 0.1, %v2483_v34  ;;  %3318 = vrcp.f32 %v2469_v25 }
 0x8fd   :  { %v2481_v36 = vadd.f32 1.0, %v2480_v10 }
 0x8fe   :  { %v2486_v27 = vmul.f32 %v3311_v6, %v2485_v23 }
 0x8ff   :  { %v2491_v37 = vsub.f32 1.0, %v2481_v36  ;;  %v2490_v60 = vmul.f32 %v2596_v46, %v2481_v36 }
 0x900   :  { %v2487_v24 = vadd.f32 %v2486_v27, %v2484_v57 }
 0x901   :  { %v2492_v33 = vmul.f32 %v2491_v37, %v2240_v7 }
 0x902   :  { %v2488_v63 = vmul.f32 1.8, %v2487_v24 }
 0x903   :  { %v2493_v45 = vadd.f32 %v2492_v33, %v2490_v60 }
 0x904   :  { %v2489_v21 = vadd.f32 0.04, %v2488_v63 }
 0x905   :  { %v3317_v48 = vpop.eup %3316 }
 0x906   :  { %v2494_v13 = vmul.f32 %v3311_v6, %v2489_v21  ;;  %v2505_v40 = vmul.f32 %v3317_v48, %v4585_v20  ;;  %v3319_v54 = vpop.eup %3318 }
 0x908   :  { %v2495_v16 = vmul.f32 0.01, %v2494_v13 }
 0x90a   :  { %v2496_v35 = vsub.f32 %v2493_v45, %v2495_v16 }
 0x90c   :  { %v2497_v41 = vsub.f32 %v2496_v35, %v2489_v21  ;;  %v2501_v14 = vmul.f32 0.99004984, %v2496_v35 }
 0x90e   :  { %vm2498_vm9 = vcmp.gt.f32.partialorder %v2497_v41, 0.0 }
 0x90f   :  { %v2597_v29 = vsel %vm2498_vm9, 1.0, %v3322_v2 }
 0x910   :  { %v2502_v55 = vmul.f32 0.009950167, %v2597_v29  ;;  %v2506_v56 = vmul.f32 %v3311_v6, %v2597_v29 }
 0x912   :  { %v2503_v19 = vadd.f32 %v2502_v55, %v2501_v14 }
 0x914   :  { %v2504_v0 = vadd.f32 0.08, %v2503_v19 }
 0x916   :  { %v2507_v51 = vmul.f32 %v2506_v56, %v2504_v0 }
 0x918   :  { %v2508_v58 = vadd.f32 %v2507_v51, %v2505_v40 }
 0x91a   :  { %3320 = vtanh.f32 %v2508_v58  ;;  %2515 = vst [vmem:[%s4608_s5] sm:$0xff] %v2508_v58 }
 0x924   :  { %v3321_v2 = vpop.eup %3320 }
 0x925   :  { %v2510_v44 = vmul.f32 %v3321_v2, %v3319_v54 }
 0x927   :  { %2598 = vst [vmem:[%s4607_s4 + $0x38] sm:$0xff] %v2510_v44 }

</bundles_post_ra>
